<compile_context>
chip_gen: v5e
topology: v5e:2x2
jax: 0.10.0
libtpu: 0.0.40
codegen_flags: <defaults>
</compile_context>

<pallas_src>
import functools

import jax
import jax.numpy as jnp
from jax.experimental import pallas as pl
from jax.experimental.pallas import tpu as pltpu


def _transformer_kernel(d_model, prompt_idx,
                        img_ref, pos_ref,
                        wqkv_ref, bqkv_ref,
                        wo_ref, bo_ref,
                        g1_ref, be1_ref,
                        w1_ref, bf1_ref, w2_ref, bf2_ref,
                        g2_ref, be2_ref,
                        wlt_ref, bl_ref,
                        out_ref):
    """Whole forward pass, fully resident in VMEM. img_ref is (HW, C)."""
    eps = 1e-5
    C = d_model
    f32 = jnp.float32
    bf16 = jnp.bfloat16

    # ---- in-kernel token assembly (no (S,C) pos/src HBM arrays) ----
    img = img_ref[...]                                             # (HW, C)
    x_img = img + pos_ref[1:2, :]                                  # image tokens, pos id 1
    x_p = img[prompt_idx:prompt_idx + 1, :] + pos_ref[0:1, :]      # prompt token, pos id 0

    # ---- fused QKV projection: one (.,C)@(C,3C) MXU pass per block ----
    qkv = jnp.dot(x_img.astype(bf16), wqkv_ref[...],
                  preferred_element_type=f32) + bqkv_ref[...]      # (HW, 3C)
    qkv_p = jnp.dot(x_p.astype(bf16), wqkv_ref[...],
                    preferred_element_type=f32) + bqkv_ref[...]    # (1, 3C)
    scale = 1.0 / (float(C) ** 0.5)
    q = qkv[:, 0:C] * scale                                        # (HW, C)
    k = qkv[:, C:2 * C]                                            # (HW, C)
    v = qkv[:, 2 * C:3 * C]                                        # (HW, C)
    k_p = qkv_p[:, C:2 * C]                                        # (1, C)
    v_p = qkv_p[:, 2 * C:3 * C]                                    # (1, C)

    # ---- single-head attention, blockwise over {image tokens} U {prompt} ----
    s = jax.lax.dot_general(q.astype(bf16), k.astype(bf16),
                            (((1,), (1,)), ((), ())),
                            preferred_element_type=f32)            # (HW, HW)
    s_p = jnp.sum(q * k_p, axis=-1, keepdims=True)                 # (HW, 1)
    m = jnp.maximum(jnp.max(s, axis=-1, keepdims=True), s_p)       # softmax over all 65 keys
    e = jnp.exp(s - m)
    e_p = jnp.exp(s_p - m)
    denom = jnp.sum(e, axis=-1, keepdims=True) + e_p
    ctx = jnp.dot(e.astype(bf16), v.astype(bf16),
                  preferred_element_type=f32) + e_p * v_p          # (HW, C)
    ctx = ctx * pl.reciprocal(denom, approx=True)                  # EUP reciprocal
    attn = jnp.dot(ctx.astype(bf16), wo_ref[...],
                   preferred_element_type=f32) + bo_ref[...]

    # ---- residual + LayerNorm1 (f32) ----
    x = x_img + attn
    mu = jnp.mean(x, axis=-1, keepdims=True)
    var = jnp.mean((x - mu) * (x - mu), axis=-1, keepdims=True)
    x = (x - mu) * jax.lax.rsqrt(var + eps) * g1_ref[...] + be1_ref[...]

    # ---- feed-forward (relu), dim_feedforward = 8 ----
    h = jnp.dot(x.astype(bf16), w1_ref[...],
                preferred_element_type=f32) + bf1_ref[...]
    h = jnp.maximum(h, 0.0)
    ff = jnp.dot(h.astype(bf16), w2_ref[...],
                 preferred_element_type=f32) + bf2_ref[...]

    # ---- residual + LayerNorm2 (f32) ----
    x = x + ff
    mu = jnp.mean(x, axis=-1, keepdims=True)
    var = jnp.mean((x - mu) * (x - mu), axis=-1, keepdims=True)
    x = (x - mu) * jax.lax.rsqrt(var + eps) * g2_ref[...] + be2_ref[...]

    # ---- output head, lane-dense: logits as (1, HW) ----
    logits = jax.lax.dot_general(wlt_ref[...], x.astype(bf16),
                                 (((1,), (1,)), ((), ())),
                                 preferred_element_type=f32) + bl_ref[...]
    out_ref[...] = jax.nn.sigmoid(logits)                          # (1, HW)


def prepare_fused_params(params):
    """One-time packing: fuse QKV, pre-transpose the head, cast MXU weights to bf16.
    Done once (outside the per-call path) so the wrapper issues no extra XLA ops."""
    bf16 = jnp.bfloat16
    return dict(
        pos_emb=params["pos_emb"],
        wqkv=jnp.concatenate([params["wq"], params["wk"], params["wv"]],
                             axis=1).astype(bf16),                 # (C, 3C)
        bqkv=jnp.concatenate([params["bq"], params["bk"], params["bv"]], axis=1),
        wo=params["wo"].astype(bf16), bo=params["bo"],
        ln1_g=params["ln1_g"], ln1_b=params["ln1_b"],
        w1=params["w1"].astype(bf16), b1=params["b1"],
        w2=params["w2"].astype(bf16), b2=params["b2"],
        ln2_g=params["ln2_g"], ln2_b=params["ln2_b"],
        wlt=params["wl"].T.astype(bf16),                           # (1, C)
        bl=params["bl"],                                           # (1, 1)
    )


def transformer_encoder_forward(image, prompt_coord, fused):
    H, W, C = image.shape
    HW = H * W
    image_flat = image.reshape(HW, C)
    prompt_idx = int(prompt_coord[0]) * W + int(prompt_coord[1])
    # TODO(synk): for a runtime prompt_coord, feed the index via scalar prefetch
    # (SMEM) instead of baking it into the trace (current form retraces per coord).

    kernel = functools.partial(_transformer_kernel, C, prompt_idx)
    args = (image_flat, fused["pos_emb"],
            fused["wqkv"], fused["bqkv"], fused["wo"], fused["bo"],
            fused["ln1_g"], fused["ln1_b"],
            fused["w1"], fused["b1"], fused["w2"], fused["b2"],
            fused["ln2_g"], fused["ln2_b"],
            fused["wlt"], fused["bl"])

    vmem = pl.BlockSpec(memory_space=pltpu.MemorySpace.VMEM)
    out = pl.pallas_call(
        kernel,
        out_shape=jax.ShapeDtypeStruct((1, HW), jnp.float32),
        in_specs=[vmem] * len(args),
        out_specs=vmem,
    )(*args)
    # Lane-dense (1, HW) kernel output -> (H, W) map; no slicing needed.
    # TODO(synk): to process a batch of (image, prompt) pairs, wrap this in a
    # grid=(B,) pallas_call with dimension_semantics=("parallel",) so v7x's two
    # TensorCores split the batch; per-image the kernel is launch-latency bound.
    return out.reshape(H, W)


def reference_forward(image, prompt_coord, params):
    """Pure-JAX f32 reference implementing the module math (original token order)."""
    H, W, C = image.shape
    eps = 1e-5
    prompt = image[prompt_coord[0], prompt_coord[1]][None, :]
    image_flat = image.reshape(H * W, C)
    src = jnp.concatenate([prompt, image_flat], axis=0)
    pos = jnp.concatenate(
        [params["pos_emb"][0:1],
         jnp.broadcast_to(params["pos_emb"][1:2], (H * W, C))], axis=0)
    x = src + pos
    q = x @ params["wq"] + params["bq"]
    k = x @ params["wk"] + params["bk"]
    v = x @ params["wv"] + params["bv"]
    s = (q / jnp.sqrt(jnp.float32(C))) @ k.T
    p = jax.nn.softmax(s, axis=-1)
    attn = (p @ v) @ params["wo"] + params["bo"]
    x = x + attn
    mu = jnp.mean(x, axis=-1, keepdims=True)
    var = jnp.mean((x - mu) ** 2, axis=-1, keepdims=True)
    x = (x - mu) / jnp.sqrt(var + eps) * params["ln1_g"] + params["ln1_b"]
    h = jnp.maximum(x @ params["w1"] + params["b1"], 0.0)
    x = x + (h @ params["w2"] + params["b2"])
    mu = jnp.mean(x, axis=-1, keepdims=True)
    var = jnp.mean((x - mu) ** 2, axis=-1, keepdims=True)
    x = (x - mu) / jnp.sqrt(var + eps) * params["ln2_g"] + params["ln2_b"]
    out = jax.nn.sigmoid(x @ params["wl"] + params["bl"])
    return out[1:, 0].reshape(H, W)


def init_params(key, vocab_dim, ffn_dim=8):
    """Deterministic synthetic parameters (shapes from the module's __init__)."""
    C, F = vocab_dim, ffn_dim
    ks = jax.random.split(key, 16)

    def w(k, shape, scale=0.1):
        return (scale * jax.random.normal(k, shape)).astype(jnp.float32)

    return dict(
        pos_emb=w(ks[0], (2, C)),                       # nn.Embedding(2, vocab_dim)
        wq=w(ks[1], (C, C)), bq=w(ks[2], (1, C)),       # in_proj (q)
        wk=w(ks[3], (C, C)), bk=w(ks[4], (1, C)),       # in_proj (k)
        wv=w(ks[5], (C, C)), bv=w(ks[6], (1, C)),       # in_proj (v)
        wo=w(ks[7], (C, C)), bo=w(ks[8], (1, C)),       # out_proj
        ln1_g=jnp.ones((1, C), jnp.float32), ln1_b=jnp.zeros((1, C), jnp.float32),
        w1=w(ks[9], (C, F)), b1=w(ks[10], (1, F)),      # linear1 (C -> 8)
        w2=w(ks[11], (F, C)), b2=w(ks[12], (1, C)),     # linear2 (8 -> C)
        ln2_g=jnp.ones((1, C), jnp.float32), ln2_b=jnp.zeros((1, C), jnp.float32),
        wl=w(ks[13], (C, 1)), bl=w(ks[14], (1, 1)),     # lin (C -> 1)
    )


if __name__ == "__main__":
    H, W, C = 8, 8, 32                 # image (H, W, C); tokens S = H*W + 1 = 65
    key = jax.random.PRNGKey(0)
    k_img, k_par = jax.random.split(key)
    image = jax.random.normal(k_img, (H, W, C), dtype=jnp.float32)
    prompt_coord = (3, 5)              # static prompt coordinate
    params = init_params(k_par, C)
    fused = prepare_fused_params(params)

    out = transformer_encoder_forward(image, prompt_coord, fused)
    out = jax.block_until_ready(out)

    ref = reference_forward(image, prompt_coord, params)
    assert out.shape == (H, W)
    assert bool(jnp.all(jnp.isfinite(out)))
    # bf16 MXU operands + approx EUP reciprocal (per perf review) -> relaxed
    # tolerance vs the pure-f32 reference; sigmoid keeps the error well bounded.
    assert bool(jnp.allclose(out, ref, atol=1e-2, rtol=1e-2)), (
        f"max abs err = {float(jnp.max(jnp.abs(out - ref)))}")
    print("KERNEL_OK")
</pallas_src>

<mosaic_0001>
module attributes {stable_mosaic.version = 11 : i64} {
  func.func @_transformer_kernel(%arg0: memref<64x32xf32, #tpu.memory_space<vmem>>, %arg1: memref<2x32xf32, #tpu.memory_space<vmem>>, %arg2: memref<32x96xbf16, #tpu.memory_space<vmem>>, %arg3: memref<1x96xf32, #tpu.memory_space<vmem>>, %arg4: memref<32x32xbf16, #tpu.memory_space<vmem>>, %arg5: memref<1x32xf32, #tpu.memory_space<vmem>>, %arg6: memref<1x32xf32, #tpu.memory_space<vmem>>, %arg7: memref<1x32xf32, #tpu.memory_space<vmem>>, %arg8: memref<32x8xbf16, #tpu.memory_space<vmem>>, %arg9: memref<1x8xf32, #tpu.memory_space<vmem>>, %arg10: memref<8x32xbf16, #tpu.memory_space<vmem>>, %arg11: memref<1x32xf32, #tpu.memory_space<vmem>>, %arg12: memref<1x32xf32, #tpu.memory_space<vmem>>, %arg13: memref<1x32xf32, #tpu.memory_space<vmem>>, %arg14: memref<1x32xbf16, #tpu.memory_space<vmem>>, %arg15: memref<1x1xf32, #tpu.memory_space<vmem>>, %arg16: memref<1x64xf32, #tpu.memory_space<vmem>>) attributes {dimension_semantics = [], scalar_prefetch = 0 : i64, scratch_operands = 0 : i64, tpu.core_type = #tpu.core_type<tc>} {
    %c0 = arith.constant 0 : index
    %c0_0 = arith.constant 0 : index
    %0 = vector.load %arg0[%c0, %c0_0] : memref<64x32xf32, #tpu.memory_space<vmem>>, vector<64x32xf32>
    %c1 = arith.constant 1 : index
    %c0_1 = arith.constant 0 : index
    %1 = vector.load %arg1[%c1, %c0_1] : memref<2x32xf32, #tpu.memory_space<vmem>>, vector<1x32xf32>
    %2 = vector.broadcast %1 : vector<1x32xf32> to vector<64x32xf32>
    %3 = arith.addf %0, %2 : vector<64x32xf32>
    %4 = vector.extract_strided_slice %0 {offsets = [29, 0], sizes = [1, 32], strides = [1, 1]} : vector<64x32xf32> to vector<1x32xf32>
    %c0_2 = arith.constant 0 : index
    %c0_3 = arith.constant 0 : index
    %5 = vector.load %arg1[%c0_2, %c0_3] : memref<2x32xf32, #tpu.memory_space<vmem>>, vector<1x32xf32>
    %6 = arith.addf %4, %5 : vector<1x32xf32>
    %7 = arith.truncf %3 : vector<64x32xf32> to vector<64x32xbf16>
    %c0_4 = arith.constant 0 : index
    %c0_5 = arith.constant 0 : index
    %8 = vector.load %arg2[%c0_4, %c0_5] : memref<32x96xbf16, #tpu.memory_space<vmem>>, vector<32x96xbf16>
    %cst = arith.constant dense<0.000000e+00> : vector<64x96xf32>
    %9 = tpu.matmul %7, %8, %cst {dimension_numbers = #tpu.dot_dimension_numbers<[1], [0], [0], [1], [0, 0, 1, 1], [], []>} : vector<64x32xbf16>, vector<32x96xbf16>, vector<64x96xf32> -> vector<64x96xf32>
    %c0_6 = arith.constant 0 : index
    %c0_7 = arith.constant 0 : index
    %10 = vector.load %arg3[%c0_6, %c0_7] : memref<1x96xf32, #tpu.memory_space<vmem>>, vector<1x96xf32>
    %11 = vector.broadcast %10 : vector<1x96xf32> to vector<64x96xf32>
    %12 = arith.addf %9, %11 : vector<64x96xf32>
    %13 = arith.truncf %6 : vector<1x32xf32> to vector<1x32xbf16>
    %c0_8 = arith.constant 0 : index
    %c0_9 = arith.constant 0 : index
    %14 = vector.load %arg2[%c0_8, %c0_9] : memref<32x96xbf16, #tpu.memory_space<vmem>>, vector<32x96xbf16>
    %cst_10 = arith.constant dense<0.000000e+00> : vector<1x96xf32>
    %15 = tpu.matmul %13, %14, %cst_10 {dimension_numbers = #tpu.dot_dimension_numbers<[1], [0], [0], [1], [0, 0, 1, 1], [], []>} : vector<1x32xbf16>, vector<32x96xbf16>, vector<1x96xf32> -> vector<1x96xf32>
    %c0_11 = arith.constant 0 : index
    %c0_12 = arith.constant 0 : index
    %16 = vector.load %arg3[%c0_11, %c0_12] : memref<1x96xf32, #tpu.memory_space<vmem>>, vector<1x96xf32>
    %17 = arith.addf %15, %16 : vector<1x96xf32>
    %18 = vector.extract_strided_slice %12 {offsets = [0, 0], sizes = [64, 32], strides = [1, 1]} : vector<64x96xf32> to vector<64x32xf32>
    %cst_13 = arith.constant 0.176776692 : f32
    %19 = vector.broadcast %cst_13 : f32 to vector<64x32xf32>
    %20 = arith.mulf %18, %19 : vector<64x32xf32>
    %21 = vector.extract_strided_slice %12 {offsets = [0, 32], sizes = [64, 32], strides = [1, 1]} : vector<64x96xf32> to vector<64x32xf32>
    %22 = vector.extract_strided_slice %12 {offsets = [0, 64], sizes = [64, 32], strides = [1, 1]} : vector<64x96xf32> to vector<64x32xf32>
    %23 = vector.extract_strided_slice %17 {offsets = [0, 32], sizes = [1, 32], strides = [1, 1]} : vector<1x96xf32> to vector<1x32xf32>
    %24 = vector.extract_strided_slice %17 {offsets = [0, 64], sizes = [1, 32], strides = [1, 1]} : vector<1x96xf32> to vector<1x32xf32>
    %25 = arith.truncf %20 : vector<64x32xf32> to vector<64x32xbf16>
    %26 = arith.truncf %21 : vector<64x32xf32> to vector<64x32xbf16>
    %cst_14 = arith.constant dense<0.000000e+00> : vector<64x64xf32>
    %27 = tpu.matmul %25, %26, %cst_14 {dimension_numbers = #tpu.dot_dimension_numbers<[1], [1], [0], [0], [0, 0, 1, 0], [], []>} : vector<64x32xbf16>, vector<64x32xbf16>, vector<64x64xf32> -> vector<64x64xf32>
    %28 = vector.broadcast %23 : vector<1x32xf32> to vector<64x32xf32>
    %29 = arith.mulf %20, %28 : vector<64x32xf32>
    %cst_15 = arith.constant dense<0.000000e+00> : vector<64xf32>
    %30 = vector.multi_reduction <add>, %29, %cst_15 [1] : vector<64x32xf32> to vector<64xf32>
    %31 = vector.shape_cast %30 : vector<64xf32> to vector<64x1xf32>
    %cst_16 = arith.constant dense<0xFF800000> : vector<64xf32>
    %32 = vector.multi_reduction <maximumf>, %27, %cst_16 [1] : vector<64x64xf32> to vector<64xf32>
    %33 = vector.shape_cast %32 : vector<64xf32> to vector<64x1xf32>
    %34 = arith.maximumf %33, %31 : vector<64x1xf32>
    %35 = vector.broadcast %34 : vector<64x1xf32> to vector<64x64xf32>
    %36 = arith.subf %27, %35 : vector<64x64xf32>
    %37 = math.exp %36 : vector<64x64xf32>
    %38 = arith.subf %31, %34 : vector<64x1xf32>
    %39 = math.exp %38 : vector<64x1xf32>
    %cst_17 = arith.constant dense<0.000000e+00> : vector<64xf32>
    %40 = vector.multi_reduction <add>, %37, %cst_17 [1] : vector<64x64xf32> to vector<64xf32>
    %41 = vector.shape_cast %40 : vector<64xf32> to vector<64x1xf32>
    %42 = arith.addf %41, %39 : vector<64x1xf32>
    %43 = arith.truncf %37 : vector<64x64xf32> to vector<64x64xbf16>
    %44 = arith.truncf %22 : vector<64x32xf32> to vector<64x32xbf16>
    %cst_18 = arith.constant dense<0.000000e+00> : vector<64x32xf32>
    %45 = tpu.matmul %43, %44, %cst_18 {dimension_numbers = #tpu.dot_dimension_numbers<[1], [0], [0], [1], [0, 0, 1, 1], [], []>} : vector<64x64xbf16>, vector<64x32xbf16>, vector<64x32xf32> -> vector<64x32xf32>
    %46 = vector.broadcast %39 : vector<64x1xf32> to vector<64x32xf32>
    %47 = vector.broadcast %24 : vector<1x32xf32> to vector<64x32xf32>
    %48 = arith.mulf %46, %47 : vector<64x32xf32>
    %49 = arith.addf %45, %48 : vector<64x32xf32>
    %50 = tpu.reciprocal %42 {approx = true} : vector<64x1xf32> -> vector<64x1xf32>
    %51 = vector.broadcast %50 : vector<64x1xf32> to vector<64x32xf32>
    %52 = arith.mulf %49, %51 : vector<64x32xf32>
    %53 = arith.truncf %52 : vector<64x32xf32> to vector<64x32xbf16>
    %c0_19 = arith.constant 0 : index
    %c0_20 = arith.constant 0 : index
    %54 = vector.load %arg4[%c0_19, %c0_20] : memref<32x32xbf16, #tpu.memory_space<vmem>>, vector<32x32xbf16>
    %cst_21 = arith.constant dense<0.000000e+00> : vector<64x32xf32>
    %55 = tpu.matmul %53, %54, %cst_21 {dimension_numbers = #tpu.dot_dimension_numbers<[1], [0], [0], [1], [0, 0, 1, 1], [], []>} : vector<64x32xbf16>, vector<32x32xbf16>, vector<64x32xf32> -> vector<64x32xf32>
    %c0_22 = arith.constant 0 : index
    %c0_23 = arith.constant 0 : index
    %56 = vector.load %arg5[%c0_22, %c0_23] : memref<1x32xf32, #tpu.memory_space<vmem>>, vector<1x32xf32>
    %57 = vector.broadcast %56 : vector<1x32xf32> to vector<64x32xf32>
    %58 = arith.addf %55, %57 : vector<64x32xf32>
    %59 = arith.addf %3, %58 : vector<64x32xf32>
    %cst_24 = arith.constant dense<0.000000e+00> : vector<64xf32>
    %60 = vector.multi_reduction <add>, %59, %cst_24 [1] : vector<64x32xf32> to vector<64xf32>
    %61 = vector.shape_cast %60 : vector<64xf32> to vector<64x1xf32>
    %cst_25 = arith.constant 3.200000e+01 : f32
    %62 = vector.broadcast %cst_25 : f32 to vector<64x1xf32>
    %63 = arith.divf %61, %62 : vector<64x1xf32>
    %64 = vector.broadcast %63 : vector<64x1xf32> to vector<64x32xf32>
    %65 = arith.subf %59, %64 : vector<64x32xf32>
    %66 = vector.broadcast %63 : vector<64x1xf32> to vector<64x32xf32>
    %67 = arith.subf %59, %66 : vector<64x32xf32>
    %68 = arith.mulf %65, %67 : vector<64x32xf32>
    %cst_26 = arith.constant dense<0.000000e+00> : vector<64xf32>
    %69 = vector.multi_reduction <add>, %68, %cst_26 [1] : vector<64x32xf32> to vector<64xf32>
    %70 = vector.shape_cast %69 : vector<64xf32> to vector<64x1xf32>
    %cst_27 = arith.constant 3.200000e+01 : f32
    %71 = vector.broadcast %cst_27 : f32 to vector<64x1xf32>
    %72 = arith.divf %70, %71 : vector<64x1xf32>
    %73 = vector.broadcast %63 : vector<64x1xf32> to vector<64x32xf32>
    %74 = arith.subf %59, %73 : vector<64x32xf32>
    %cst_28 = arith.constant 9.99999974E-6 : f32
    %75 = vector.broadcast %cst_28 : f32 to vector<64x1xf32>
    %76 = arith.addf %72, %75 : vector<64x1xf32>
    %77 = math.rsqrt %76 : vector<64x1xf32>
    %78 = vector.broadcast %77 : vector<64x1xf32> to vector<64x32xf32>
    %79 = arith.mulf %74, %78 : vector<64x32xf32>
    %c0_29 = arith.constant 0 : index
    %c0_30 = arith.constant 0 : index
    %80 = vector.load %arg6[%c0_29, %c0_30] : memref<1x32xf32, #tpu.memory_space<vmem>>, vector<1x32xf32>
    %81 = vector.broadcast %80 : vector<1x32xf32> to vector<64x32xf32>
    %82 = arith.mulf %79, %81 : vector<64x32xf32>
    %c0_31 = arith.constant 0 : index
    %c0_32 = arith.constant 0 : index
    %83 = vector.load %arg7[%c0_31, %c0_32] : memref<1x32xf32, #tpu.memory_space<vmem>>, vector<1x32xf32>
    %84 = vector.broadcast %83 : vector<1x32xf32> to vector<64x32xf32>
    %85 = arith.addf %82, %84 : vector<64x32xf32>
    %86 = arith.truncf %85 : vector<64x32xf32> to vector<64x32xbf16>
    %c0_33 = arith.constant 0 : index
    %c0_34 = arith.constant 0 : index
    %87 = vector.load %arg8[%c0_33, %c0_34] : memref<32x8xbf16, #tpu.memory_space<vmem>>, vector<32x8xbf16>
    %cst_35 = arith.constant dense<0.000000e+00> : vector<64x8xf32>
    %88 = tpu.matmul %86, %87, %cst_35 {dimension_numbers = #tpu.dot_dimension_numbers<[1], [0], [0], [1], [0, 0, 1, 1], [], []>} : vector<64x32xbf16>, vector<32x8xbf16>, vector<64x8xf32> -> vector<64x8xf32>
    %c0_36 = arith.constant 0 : index
    %c0_37 = arith.constant 0 : index
    %89 = vector.load %arg9[%c0_36, %c0_37] : memref<1x8xf32, #tpu.memory_space<vmem>>, vector<1x8xf32>
    %90 = vector.broadcast %89 : vector<1x8xf32> to vector<64x8xf32>
    %91 = arith.addf %88, %90 : vector<64x8xf32>
    %cst_38 = arith.constant 0.000000e+00 : f32
    %92 = vector.broadcast %cst_38 : f32 to vector<64x8xf32>
    %93 = arith.maximumf %91, %92 : vector<64x8xf32>
    %94 = arith.truncf %93 : vector<64x8xf32> to vector<64x8xbf16>
    %c0_39 = arith.constant 0 : index
    %c0_40 = arith.constant 0 : index
    %95 = vector.load %arg10[%c0_39, %c0_40] : memref<8x32xbf16, #tpu.memory_space<vmem>>, vector<8x32xbf16>
    %cst_41 = arith.constant dense<0.000000e+00> : vector<64x32xf32>
    %96 = tpu.matmul %94, %95, %cst_41 {dimension_numbers = #tpu.dot_dimension_numbers<[1], [0], [0], [1], [0, 0, 1, 1], [], []>} : vector<64x8xbf16>, vector<8x32xbf16>, vector<64x32xf32> -> vector<64x32xf32>
    %c0_42 = arith.constant 0 : index
    %c0_43 = arith.constant 0 : index
    %97 = vector.load %arg11[%c0_42, %c0_43] : memref<1x32xf32, #tpu.memory_space<vmem>>, vector<1x32xf32>
    %98 = vector.broadcast %97 : vector<1x32xf32> to vector<64x32xf32>
    %99 = arith.addf %96, %98 : vector<64x32xf32>
    %100 = arith.addf %85, %99 : vector<64x32xf32>
    %cst_44 = arith.constant dense<0.000000e+00> : vector<64xf32>
    %101 = vector.multi_reduction <add>, %100, %cst_44 [1] : vector<64x32xf32> to vector<64xf32>
    %102 = vector.shape_cast %101 : vector<64xf32> to vector<64x1xf32>
    %cst_45 = arith.constant 3.200000e+01 : f32
    %103 = vector.broadcast %cst_45 : f32 to vector<64x1xf32>
    %104 = arith.divf %102, %103 : vector<64x1xf32>
    %105 = vector.broadcast %104 : vector<64x1xf32> to vector<64x32xf32>
    %106 = arith.subf %100, %105 : vector<64x32xf32>
    %107 = vector.broadcast %104 : vector<64x1xf32> to vector<64x32xf32>
    %108 = arith.subf %100, %107 : vector<64x32xf32>
    %109 = arith.mulf %106, %108 : vector<64x32xf32>
    %cst_46 = arith.constant dense<0.000000e+00> : vector<64xf32>
    %110 = vector.multi_reduction <add>, %109, %cst_46 [1] : vector<64x32xf32> to vector<64xf32>
    %111 = vector.shape_cast %110 : vector<64xf32> to vector<64x1xf32>
    %cst_47 = arith.constant 3.200000e+01 : f32
    %112 = vector.broadcast %cst_47 : f32 to vector<64x1xf32>
    %113 = arith.divf %111, %112 : vector<64x1xf32>
    %114 = vector.broadcast %104 : vector<64x1xf32> to vector<64x32xf32>
    %115 = arith.subf %100, %114 : vector<64x32xf32>
    %cst_48 = arith.constant 9.99999974E-6 : f32
    %116 = vector.broadcast %cst_48 : f32 to vector<64x1xf32>
    %117 = arith.addf %113, %116 : vector<64x1xf32>
    %118 = math.rsqrt %117 : vector<64x1xf32>
    %119 = vector.broadcast %118 : vector<64x1xf32> to vector<64x32xf32>
    %120 = arith.mulf %115, %119 : vector<64x32xf32>
    %c0_49 = arith.constant 0 : index
    %c0_50 = arith.constant 0 : index
    %121 = vector.load %arg12[%c0_49, %c0_50] : memref<1x32xf32, #tpu.memory_space<vmem>>, vector<1x32xf32>
    %122 = vector.broadcast %121 : vector<1x32xf32> to vector<64x32xf32>
    %123 = arith.mulf %120, %122 : vector<64x32xf32>
    %c0_51 = arith.constant 0 : index
    %c0_52 = arith.constant 0 : index
    %124 = vector.load %arg13[%c0_51, %c0_52] : memref<1x32xf32, #tpu.memory_space<vmem>>, vector<1x32xf32>
    %125 = vector.broadcast %124 : vector<1x32xf32> to vector<64x32xf32>
    %126 = arith.addf %123, %125 : vector<64x32xf32>
    %c0_53 = arith.constant 0 : index
    %c0_54 = arith.constant 0 : index
    %127 = vector.load %arg14[%c0_53, %c0_54] : memref<1x32xbf16, #tpu.memory_space<vmem>>, vector<1x32xbf16>
    %128 = arith.truncf %126 : vector<64x32xf32> to vector<64x32xbf16>
    %cst_55 = arith.constant dense<0.000000e+00> : vector<1x64xf32>
    %129 = tpu.matmul %127, %128, %cst_55 {dimension_numbers = #tpu.dot_dimension_numbers<[1], [1], [0], [0], [0, 0, 1, 0], [], []>} : vector<1x32xbf16>, vector<64x32xbf16>, vector<1x64xf32> -> vector<1x64xf32>
    %c0_56 = arith.constant 0 : index
    %c0_57 = arith.constant 0 : index
    %130 = vector.load %arg15[%c0_56, %c0_57] : memref<1x1xf32, #tpu.memory_space<vmem>>, vector<1x1xf32>
    %131 = vector.broadcast %130 : vector<1x1xf32> to vector<1x64xf32>
    %132 = arith.addf %129, %131 : vector<1x64xf32>
    %133 = arith.negf %132 : vector<1x64xf32>
    %134 = math.exp %133 : vector<1x64xf32>
    %cst_58 = arith.constant 1.000000e+00 : f32
    %135 = vector.broadcast %cst_58 : f32 to vector<1x64xf32>
    %136 = arith.addf %135, %134 : vector<1x64xf32>
    %137 = arith.divf %135, %136 : vector<1x64xf32>
    %c0_59 = arith.constant 0 : index
    %c0_60 = arith.constant 0 : index
    %138 = vector.load %arg16[%c0_59, %c0_60] : memref<1x64xf32, #tpu.memory_space<vmem>>, vector<1x64xf32>
    tpu.vector_store %arg16[%c0_59, %c0_60], %137 {strides = array<i32>} : memref<1x64xf32, #tpu.memory_space<vmem>>, vector<1x64xf32>,
    return
  }
}

</mosaic_0001>

<bundles_post_ra>
// kernel: tpu_custom_call.1
= control target key start
LH: loop header
LB: loop body
LE: loop exit
PB: predicated region body
PF: predicated region fallthrough
CT: control target
= control target key end

     0   :  { %s2015_s0 = inlined_call_operand.vmem [shape: f32[64,32], index: 0, kind: input, shape index: {}]   ;;  %s2016_s1 = inlined_call_operand.vmem [shape: f32[2,32], index: 1, kind: input, shape index: {}]   ;;  %s2017_s2 = inlined_call_operand.vmem [shape: bf16[32,96], index: 2, kind: input, shape index: {}]   ;;  %s2018_s3 = inlined_call_operand.vmem [shape: f32[1,96], index: 3, kind: input, shape index: {}]   ;;  %s2019_s4 = inlined_call_operand.vmem [shape: bf16[32,32], index: 4, kind: input, shape index: {}]   ;;  %s2020_s5 = inlined_call_operand.vmem [shape: f32[1,32], index: 5, kind: input, shape index: {}]   ;;  %s2021_s6 = inlined_call_operand.vmem [shape: f32[1,32], index: 6, kind: input, shape index: {}]   ;;  %s2022_s7 = inlined_call_operand.vmem [shape: f32[1,32], index: 7, kind: input, shape index: {}]   ;;  %s2023_s8 = inlined_call_operand.vmem [shape: bf16[32,8], index: 8, kind: input, shape index: {}]   ;;  %s2024_s9 = inlined_call_operand.vmem [shape: f32[1,8], index: 9, kind: input, shape index: {}]   ;;  %s2025_s10 = inlined_call_operand.vmem [shape: bf16[8,32], index: 10, kind: input, shape index: {}]   ;;  %s2026_s11 = inlined_call_operand.vmem [shape: f32[1,32], index: 11, kind: input, shape index: {}]   ;;  %s2027_s12 = inlined_call_operand.vmem [shape: f32[1,32], index: 12, kind: input, shape index: {}]   ;;  %s2028_s13 = inlined_call_operand.vmem [shape: f32[1,32], index: 13, kind: input, shape index: {}]   ;;  %s2029_s14 = inlined_call_operand.vmem [shape: bf16[1,32], index: 14, kind: input, shape index: {}]   ;;  %s2030_s15 = inlined_call_operand.<no memory space> [shape: f32[1,1], index: 15, kind: input, shape index: {}]   ;;  %s2031_s16 = inlined_call_operand.hbm [shape: f32[1,64], index: 16, kind: output, shape index: {}]  }
   0x1   :  { %2033 = sst [smem:[#allocation6_spill]] %s2015_s0  ;;  %v21_v0 = vstv %s2030_s15 }
   0x2   :  { %22 = vst [vmem:[#allocation2] sm:$0x1] %v21_v0 }
   0x3   :  { %v1256_v1 = vld [vmem:[%s2017_s2 + $0x8] sm:$0xff]  ;;  %s2034_s27 = sld [smem:[#allocation6_spill]]  ;;  %v1273_v4 = vld [vmem:[%s2016_s1 + $0x1] ss:$0 sm:$0xff]  ;;  %vm104_vm0 = vcmask 261120  }
   0x4   :  { %123 = vmatpush.bf16.msra.mxu0 %v1256_v1  ;;  %1261 = vmatpush.bf16.msra.mxu1 %v1256_v1  ;;  %v1255_v5 = vld [vmem:[%s2017_s2] sm:$0xff] }
   0x5   :  { %v75_v12 = vld [vmem:[%s2016_s1] sm:$0x1] }
   0x6   :  { %v77_v14 = vrot.slane %v75_v12, 3 }
   0x8   :  { %124 = vmatpush.bf16.msra.mxu0 %v1255_v5  ;;  %1262 = vmatpush.bf16.msra.mxu1 %v1255_v5 }
   0x9   :  { %v57_v2 = vld [vmem:[%s2034_s27] sm:$0xff]  ;;  %v58_v3 = vld [vmem:[%s2034_s27 + $0x8] sm:$0xff]  ;;  %v63_v6 = vld [vmem:[%s2034_s27 + $0x30] sm:$0xff] }
   0xa   :  { %v64_v7 = vld [vmem:[%s2034_s27 + $0x38] sm:$0xff]  ;;  %v1508_v8 = vadd.f32 %v1273_v4, %v57_v2  ;;  %v1510_v9 = vadd.f32 %v1273_v4, %v58_v3  ;;  %v1512_v10 = vadd.f32 %v1273_v4, %v63_v6 }
   0xb   :  { %v1514_v11 = vadd.f32 %v1273_v4, %v64_v7  ;;  %v60_v13 = vld [vmem:[%s2034_s27 + $0x18] sm:$0xff] }
   0xc   :  { %v80_v15 = vpack.c.bf16 %v1510_v9, %v1508_v8 }
   0xd   :  { %v83_v16 = vpack.c.bf16 %v1514_v11, %v1512_v10 }
   0xe   :  { %23 = vsyncpa [#allocation4], 0  ;;  %160 = vmatpush.bf16.msrb.mxu1 %v1256_v1  ;;  %1212 = vmatmul.msk.bf16.vlgmr.msra.gmra.mxu0 %vm104_vm0, %v80_v15  ;;  %v79_v17 = vadd.f32 %v77_v14, %v60_v13  ;;  %v59_v19 = vld [vmem:[%s2034_s27 + $0x10] sm:$0xff]  ;;  %v1533_v21 = vadd.f32 %v1273_v4, %v60_v13  ;;  %v61_v25 = vld [vmem:[%s2034_s27 + $0x20] sm:$0xff]  ;;  %s1395_s19 = smov 64   ;;  %vm285_vm1 = vcmask 523264  }
   0xf   :  { %1215 = vmatmul.msk.bf16.vlgmr.msra.gmra.mxu1 %vm104_vm0, %v83_v16  ;;  %v1531_v20 = vadd.f32 %v1273_v4, %v59_v19  ;;  %v62_v26 = vld [vmem:[%s2034_s27 + $0x28] sm:$0xff]  ;;  %v1545_v27 = vadd.f32 %v1273_v4, %v61_v25  ;;  %v1274_v32 = vld [vmem:[%s2018_s3] ss:$0 sm:$0xff]  ;;  %s1394_s27 = smov 96  }
  0x10   :  { %v146_v18 = vpack.c.bf16 %v79_v17, %v79_v17  ;;  %v1547_v28 = vadd.f32 %v1273_v4, %v62_v26  ;;  %v88_v38 = vld [vmem:[%s2018_s3] sm:$0x1]  ;;  %s1195_s3 = sshll.u32 %s2031_s16, 4  ;;  %s1196_s3 = int_to_ptr.hbm [resolvable:$true] %s1195_s3 }
  0x11   :  { %v81_v23 = vpack.c.bf16 %v1533_v21, %v1531_v20 }
  0x12   :  { %161 = vmatpush.bf16.msrb.mxu1 %v1255_v5  ;;  %v148_v22 = vshrl.u32 %v146_v18, 16  ;;  %v82_v29 = vpack.c.bf16 %v1547_v28, %v1545_v27 }
  0x14   :  { %v150_v24 = vrot.slane %v148_v22, 2 }
  0x1e   :  { %1213 = vmatmul.msk.bf16.gmra.mxu0 %vm104_vm0, %v81_v23 }
  0x1f   :  { %1216 = vmatmul.msk.bf16.vlgmr.msrb.gmra.mxu1 %vm104_vm0, %v150_v24 }
  0x2e   :  { %1214 = vmatmul.msk.bf16.gmra.mxu0 %vm104_vm0, %v82_v29 }
  0x8b   :  { %v126_v30 = vpop.f32.mrf.mxu0 }
  0x8c   :  { %v141_v31 = vpop.f32.mrf.mxu1  ;;  %v127_v50 = vadd.f32 %v1274_v32, %v126_v30 }
  0x8d   :  { %v1555_v33 = vadd.f32 %v1274_v32, %v141_v31 }
  0x8e   :  { %v167_v56 = vmul.f32 0.17677669, %v127_v50 }
  0x8f   :  { %v173_v22 = vmul.f32 0.17677669, %v1555_v33 }
  0x93   :  { %v128_v34 = vpop.f32.mrf.mxu0 }
  0x94   :  { %v143_v35 = vpop.f32.mrf.mxu1  ;;  %v129_v48 = vadd.f32 %v1274_v32, %v128_v34 }
  0x95   :  { %v1557_v36 = vadd.f32 %v1274_v32, %v143_v35 }
  0x96   :  { %v179_v51 = vpack.c.bf16 %v129_v48, %v127_v50  ;;  %v168_v57 = vmul.f32 0.17677669, %v129_v48 }
  0x97   :  { %v182_v37 = vpack.c.bf16 %v1557_v36, %v1555_v33  ;;  %v174_v23 = vmul.f32 0.17677669, %v1557_v36 }
  0x98   :  { %v175_v13 = vpack.c.bf16 %v168_v57, %v167_v56 }
  0x99   :  { %193 = vrot.lane.b32.xlu0 %v182_v37, %s1394_s27  ;;  %v178_v24 = vpack.c.bf16 %v174_v23, %v173_v22 }
  0x9b   :  { %v131_v39 = vpop.f32.mrf.mxu0 }
  0x9c   :  { %v163_v40 = vpop.f32.mrf.mxu1  ;;  %v132_v45 = vadd.f32 %v1274_v32, %v131_v39 }
  0x9d   :  { %v164_v41 = vadd.f32 %v163_v40, %v88_v38 }
  0x9e   :  { %v169_v15 = vmul.f32 0.17677669, %v132_v45 }
  0x9f   :  { %v1564_v42 = vperm.slane %v164_v41, 0 }
  0xa1   :  { %250 = vrot.lane.b32.xlu2 %v1564_v42, %s1394_s27 }
  0xa3   :  { %v133_v43 = vpop.f32.mrf.mxu0 }
  0xa4   :  { %v165_v44 = vpop.f32.mrf.mxu1  ;;  %v134_v46 = vadd.f32 %v1274_v32, %v133_v43 }
  0xa6   :  { %v1567_v47 = vpack.c.bf16 %v134_v46, %v132_v45  ;;  %v170_v14 = vmul.f32 0.17677669, %v134_v46 }
  0xa8   :  { %189 = vrot.lane.b32.xlu1 %v1567_v47, %s1394_s27  ;;  %v176_v16 = vpack.c.bf16 %v170_v14, %v169_v15 }
  0xa9   :  { %416 = vrot.lane.b32.xlu2 %v182_v37, %s1395_s19 }
  0xab   :  { %v136_v49 = vpop.f32.mrf.mxu0 }
  0xac   :  { %v137_v53 = vadd.f32 %v1274_v32, %v136_v49 }
  0xae   :  { %v171_v18 = vmul.f32 0.17677669, %v137_v53 }
  0xb0   :  { %187 = vrot.lane.b32.xlu1 %v179_v51, %s1394_s27 }
  0xb3   :  { %v138_v52 = vpop.f32.mrf.mxu0 }
  0xb4   :  { %v139_v54 = vadd.f32 %v1274_v32, %v138_v52 }
  0xb6   :  { %v181_v55 = vpack.c.bf16 %v139_v54, %v137_v53  ;;  %v172_v17 = vmul.f32 0.17677669, %v139_v54 }
  0xb8   :  { %191 = vrot.lane.b32.xlu0 %v181_v55, %s1394_s27  ;;  %v177_v19 = vpack.c.bf16 %v172_v17, %v171_v18 }
  0xc0   :  { %414 = vrot.lane.b32.xlu0 %v181_v55, %s1395_s19 }
  0xfb   :  { %v1572_v58 = vpop.permute.xlu2 %250 }
  0xfc   :  { %v254_v59 = vmul.f32 %v1572_v58, %v168_v57  ;;  %v253_v60 = vmul.f32 %v1572_v58, %v167_v56  ;;  %v255_v31 = vmul.f32 %v1572_v58, %v169_v15  ;;  %v258_v35 = vmul.f32 %v1572_v58, %v172_v17 }
  0xfd   :  { %v259_v39 = vmul.f32 %v1572_v58, %v173_v22  ;;  %v260_v44 = vmul.f32 %v1572_v58, %v174_v23  ;;  %v256_v50 = vmul.f32 %v1572_v58, %v170_v14  ;;  %v257_v52 = vmul.f32 %v1572_v58, %v171_v18 }
  0xfe   :  { %v264_v61 = vsel %vm104_vm0, %v254_v59, 0.0  ;;  %v261_v62 = vsel %vm104_vm0, %v253_v60, 0.0  ;;  %v267_v33 = vsel %vm104_vm0, %v255_v31, 0.0  ;;  %v276_v37 = vsel %vm104_vm0, %v258_v35, 0.0 }
  0xff   :  { %265 = vadd.xlane.f32.xlu0 %v264_v61  ;;  %262 = vadd.xlane.f32.xlu2 %v261_v62  ;;  %v279_v41 = vsel %vm104_vm0, %v259_v39, 0.0  ;;  %v282_v46 = vsel %vm104_vm0, %v260_v44, 0.0  ;;  %v273_v53 = vsel %vm104_vm0, %v257_v52, 0.0 }
 0x103   :  { %v417_v63 = vpop.permute.xlu2 %416 }
 0x104   :  { %1263 = vmatpush.bf16.msra.mxu3 %v417_v63 }
 0x10b   :  { %v194_v0 = vpop.permute.xlu0 %193 }
 0x10c   :  { %v217_v1 = vsel %vm104_vm0, %v194_v0, 0 }
 0x10d   :  { %223 = vmatpush.bf16.xpose.msra.mxu2 %v217_v1 }
 0x113   :  { %410 = vrot.lane.b32.xlu0 %v179_v51, %s1395_s19  ;;  %v270_v51 = vsel %vm104_vm0, %v256_v50, 0.0 }
 0x11a   :  { %v190_v4 = vpop.permute.xlu1 %189 }
 0x11b   :  { %v211_v6 = vsel %vm104_vm0, %v190_v4, 0 }
 0x122   :  { %v188_v7 = vpop.permute.xlu1 %187 }
 0x123   :  { %v208_v12 = vsel %vm104_vm0, %v188_v7, 0 }
 0x12a   :  { %v192_v2 = vpop.permute.xlu0 %191 }
 0x12b   :  { %v214_v3 = vsel %vm104_vm0, %v192_v2, 0 }
 0x12c   :  { %224 = vmatpush.bf16.xpose.msra.mxu2 %v214_v3 }
 0x132   :  { %v415_v5 = vpop.permute.xlu0 %414 }
 0x133   :  { %1264 = vmatpush.bf16.msra.mxu3 %v415_v5 }
 0x134   :  { %225 = vmatpush.bf16.xpose.msra.mxu2 %v211_v6 }
 0x13c   :  { %226 = vmatpush.bf16.xpose.msra.mxu2 %v208_v12 }
 0x143   :  { %1217 = vmatmul.msk.bf16.vlgmr.msra.gmra.mxu2 %vm104_vm0, %v175_v13 }
 0x144   :  { %470 = vmatpush.bf16.msrb.mxu2 %v417_v63 }
 0x148   :  { %471 = vmatpush.bf16.msrb.mxu2 %v415_v5 }
 0x153   :  { %1218 = vmatmul.msk.bf16.gmra.mxu2 %vm104_vm0, %v176_v16 }
 0x163   :  { %1219 = vmatmul.msk.bf16.gmra.mxu2 %vm104_vm0, %v177_v19 }
 0x172   :  { %v266_v56 = vpop.xlane.xlu0 %265  ;;  %v263_v57 = vpop.xlane.xlu2 %262 }
 0x173   :  { %1220 = vmatmul.msk.bf16.gmra.mxu2 %vm104_vm0, %v178_v24 }
 0x185   :  { %v411_v58 = vpop.permute.xlu0 %410 }
 0x1c6   :  { %v228_v25 = vpop.f32.mrf.mxu2 }
 0x1c7   :  { %v286_v26 = vsel %vm285_vm1, %v228_v25, -inf }
 0x1c8   :  { %287 = vmax.xlane.f32.xlu1 %v286_v26 }
 0x1ce   :  { %v230_v29 = vpop.f32.mrf.mxu2 }
 0x1cf   :  { %v289_v30 = vsel %vm285_vm1, %v230_v29, -inf }
 0x1d0   :  { %290 = vmax.xlane.f32.xlu2 %v289_v30 }
 0x1d6   :  { %v1592_v32 = vpop.f32.mrf.mxu2 }
 0x1d7   :  { %v292_v34 = vsel %vm285_vm1, %v1592_v32, -inf }
 0x1d8   :  { %268 = vadd.xlane.f32.xlu2 %v267_v33  ;;  %293 = vmax.xlane.f32.xlu0 %v292_v34 }
 0x1de   :  { %v1598_v36 = vpop.f32.mrf.mxu2 }
 0x1df   :  { %v295_v38 = vsel %vm285_vm1, %v1598_v36, -inf }
 0x1e0   :  { %277 = vadd.xlane.f32.xlu0 %v276_v37  ;;  %296 = vmax.xlane.f32.xlu2 %v295_v38 }
 0x1e1   :  { %412 = vrot.lane.b32.xlu1 %v1567_v47, %s1395_s19 }
 0x1e6   :  { %v1606_v40 = vpop.f32.mrf.mxu2 }
 0x1e7   :  { %v298_v43 = vsel %vm285_vm1, %v1606_v40, -inf }
 0x1e8   :  { %280 = vadd.xlane.f32.xlu0 %v279_v41  ;;  %299 = vmax.xlane.f32.xlu2 %v298_v43 }
 0x1ee   :  { %v1612_v45 = vpop.f32.mrf.mxu2 }
 0x1ef   :  { %v301_v54 = vsel %vm285_vm1, %v1612_v45, -inf }
 0x1f0   :  { %283 = vadd.xlane.f32.xlu2 %v282_v46 }
 0x1f6   :  { %v1615_v48 = vpop.f32.mrf.mxu2 }
 0x1f7   :  { %v304_v55 = vsel %vm285_vm1, %v1615_v48, -inf }
 0x1fe   :  { %v1617_v47 = vpop.f32.mrf.mxu2 }
 0x1ff   :  { %v307_v49 = vsel %vm285_vm1, %v1617_v47, -inf }
 0x200   :  { %308 = vmax.xlane.f32.xlu0 %v307_v49 }
 0x20b   :  { %271 = vadd.xlane.f32.xlu1 %v270_v51 }
 0x213   :  { %274 = vadd.xlane.f32.xlu1 %v273_v53 }
 0x21b   :  { %302 = vmax.xlane.f32.xlu1 %v301_v54 }
 0x223   :  { %305 = vmax.xlane.f32.xlu1 %v304_v55 }
 0x23b   :  { %v288_v59 = vpop.xlane.xlu1 %287 }
 0x23c   :  { %v310_v60 = vmax.f32 %v288_v59, %v263_v57 }
 0x23e   :  { %v318_v61 = vsub.f32 %v228_v25, %v310_v60  ;;  %v342_v62 = vsub.f32 %v263_v57, %v310_v60 }
 0x240   :  { %v326_v63 = vmul.f32 1.442695, %v318_v61  ;;  %v350_v0 = vmul.f32 1.442695, %v342_v62 }
 0x242   :  { %1282 = vpow2.f32 %v326_v63 }
 0x243   :  { %1284 = vpow2.f32 %v350_v0  ;;  %v291_v1 = vpop.xlane.xlu2 %290 }
 0x244   :  { %v311_v2 = vmax.f32 %v291_v1, %v266_v56 }
 0x246   :  { %v319_v3 = vsub.f32 %v230_v29, %v311_v2  ;;  %v343_v18 = vsub.f32 %v266_v56, %v311_v2 }
 0x248   :  { %v1283_v4 = vpop.eup %1282  ;;  %v328_v5 = vmul.f32 1.442695, %v319_v3  ;;  %v352_v25 = vmul.f32 1.442695, %v343_v18 }
 0x249   :  { %v1629_v6 = vpop.eup %1284  ;;  %v366_v7 = vsel %vm285_vm1, %v1283_v4, 0.0 }
 0x24a   :  { %1286 = vpow2.f32 %v328_v5  ;;  %367 = vadd.xlane.f32.xlu2 %v366_v7  ;;  %v402_v12 = vmul.f32 %v1629_v6, %v1564_v42 }
 0x24b   :  { %v269_v13 = vpop.xlane.xlu2 %268  ;;  %v294_v14 = vpop.xlane.xlu0 %293 }
 0x24c   :  { %v312_v15 = vmax.f32 %v294_v14, %v269_v13  ;;  %430 = vrot.lane.b32.xlu0 %v402_v12, %s1395_s19 }
 0x24e   :  { %v320_v16 = vsub.f32 %v1592_v32, %v312_v15  ;;  %v344_v17 = vsub.f32 %v269_v13, %v312_v15 }
 0x250   :  { %v1287_v19 = vpop.eup %1286  ;;  %v330_v22 = vmul.f32 1.442695, %v320_v16  ;;  %v354_v23 = vmul.f32 1.442695, %v344_v17 }
 0x251   :  { %v369_v24 = vsel %vm285_vm1, %v1287_v19, 0.0  ;;  %v398_v32 = vpack.c.bf16 %v1287_v19, %v1283_v4 }
 0x252   :  { %1288 = vpow2.f32 %v330_v22  ;;  %370 = vadd.xlane.f32.xlu1 %v369_v24 }
 0x253   :  { %1290 = vpow2.f32 %v354_v23  ;;  %v413_v26 = vpop.permute.xlu1 %412  ;;  %v278_v37 = vpop.xlane.xlu0 %277 }
 0x254   :  { %472 = vmatpush.bf16.msrb.mxu2 %v413_v26  ;;  %1265 = vmatpush.bf16.msra.mxu3 %v413_v26  ;;  %1292 = vpow2.f32 %v352_v25  ;;  %v297_v38 = vpop.xlane.xlu2 %296 }
 0x258   :  { %v1289_v29 = vpop.eup %1288  ;;  %473 = vmatpush.bf16.msrb.mxu2 %v411_v58  ;;  %1266 = vmatpush.bf16.msra.mxu3 %v411_v58 }
 0x259   :  { %v1637_v30 = vpop.eup %1290  ;;  %v372_v31 = vsel %vm285_vm1, %v1289_v29, 0.0 }
 0x25a   :  { %373 = vadd.xlane.f32.xlu1 %v372_v31  ;;  %v404_v33 = vmul.f32 %v1637_v30, %v1564_v42  ;;  %v1644_v34 = vpop.eup %1292 }
 0x25b   :  { %1221 = vmatmul.msk.bf16.vlgmr.msrb.gmra.mxu2 %vm285_vm1, %v398_v32  ;;  %v403_v35 = vmul.f32 %v1644_v34, %v1564_v42  ;;  %v281_v39 = vpop.xlane.xlu0 %280 }
 0x25c   :  { %434 = vrot.lane.b32.xlu0 %v404_v33, %s1395_s19  ;;  %v300_v41 = vpop.xlane.xlu2 %299 }
 0x262   :  { %432 = vrot.lane.b32.xlu2 %v403_v35, %s1395_s19 }
 0x264   :  { %v284_v51 = vpop.xlane.xlu2 %283 }
 0x273   :  { %v309_v50 = vpop.xlane.xlu0 %308 }
 0x274   :  { %v317_v53 = vmax.f32 %v309_v50, %v284_v51 }
 0x276   :  { %v325_v57 = vsub.f32 %v1617_v47, %v317_v53  ;;  %v349_v22 = vsub.f32 %v284_v51, %v317_v53 }
 0x278   :  { %v340_v62 = vmul.f32 1.442695, %v325_v57  ;;  %v364_v25 = vmul.f32 1.442695, %v349_v22 }
 0x27e   :  { %v272_v43 = vpop.xlane.xlu1 %271 }
 0x27f   :  { %v313_v44 = vmax.f32 %v297_v38, %v272_v43 }
 0x281   :  { %v321_v46 = vsub.f32 %v1598_v36, %v313_v44  ;;  %v345_v1 = vsub.f32 %v272_v43, %v313_v44  ;;  %v1258_v44 = vld [vmem:[%s2019_s4 + $0x8] sm:$0xff] }
 0x282   :  { %553 = vmatpush.bf16.msra.mxu1 %v1258_v44 }
 0x283   :  { %v332_v49 = vmul.f32 1.442695, %v321_v46  ;;  %v356_v3 = vmul.f32 1.442695, %v345_v1  ;;  %v1257_v46 = vld [vmem:[%s2019_s4] sm:$0xff] }
 0x285   :  { %1294 = vpow2.f32 %v332_v49 }
 0x286   :  { %v275_v52 = vpop.xlane.xlu1 %274  ;;  %554 = vmatpush.bf16.msra.mxu1 %v1257_v46 }
 0x287   :  { %v314_v54 = vmax.f32 %v300_v41, %v275_v52 }
 0x289   :  { %v322_v55 = vsub.f32 %v1606_v40, %v314_v54  ;;  %v346_v7 = vsub.f32 %v275_v52, %v314_v54 }
 0x28b   :  { %v1295_v56 = vpop.eup %1294  ;;  %v334_v59 = vmul.f32 1.442695, %v322_v55  ;;  %v358_v16 = vmul.f32 1.442695, %v346_v7 }
 0x28c   :  { %v375_v60 = vsel %vm285_vm1, %v1295_v56, 0.0  ;;  %v399_v61 = vpack.c.bf16 %v1295_v56, %v1289_v29 }
 0x28d   :  { %1296 = vpow2.f32 %v334_v59  ;;  %376 = vadd.xlane.f32.xlu1 %v375_v60 }
 0x28e   :  { %1222 = vmatmul.msk.bf16.vlgmr.msra.gmra.mxu3 %vm285_vm1, %v399_v61  ;;  %v303_v36 = vpop.xlane.xlu1 %302  ;;  %1298 = vpow2.f32 %v340_v62 }
 0x28f   :  { %v315_v63 = vmax.f32 %v303_v36, %v278_v37 }
 0x291   :  { %v323_v0 = vsub.f32 %v1612_v45, %v315_v63  ;;  %v347_v24 = vsub.f32 %v278_v37, %v315_v63 }
 0x293   :  { %v1297_v58 = vpop.eup %1296  ;;  %v336_v40 = vmul.f32 1.442695, %v323_v0  ;;  %v360_v26 = vmul.f32 1.442695, %v347_v24 }
 0x294   :  { %v378_v2 = vsel %vm285_vm1, %v1297_v58, 0.0  ;;  %v1299_v5 = vpop.eup %1298 }
 0x295   :  { %1300 = vpow2.f32 %v336_v40  ;;  %379 = vadd.xlane.f32.xlu2 %v378_v2  ;;  %v387_v45 = vsel %vm285_vm1, %v1299_v5, 0.0 }
 0x296   :  { %v306_v47 = vpop.xlane.xlu1 %305  ;;  %1302 = vpow2.f32 %v356_v3 }
 0x297   :  { %v316_v4 = vmax.f32 %v306_v47, %v281_v39  ;;  %1304 = vpow2.f32 %v358_v16 }
 0x299   :  { %v324_v13 = vsub.f32 %v1615_v48, %v316_v4  ;;  %v348_v17 = vsub.f32 %v281_v39, %v316_v4 }
 0x29b   :  { %v1301_v12 = vpop.eup %1300  ;;  %v338_v18 = vmul.f32 1.442695, %v324_v13  ;;  %v362_v23 = vmul.f32 1.442695, %v348_v17 }
 0x29c   :  { %v381_v14 = vsel %vm285_vm1, %v1301_v12, 0.0  ;;  %v400_v15 = vpack.c.bf16 %v1301_v12, %v1297_v58  ;;  %v1303_v19 = vpop.eup %1302 }
 0x29d   :  { %382 = vadd.xlane.f32.xlu0 %v381_v14  ;;  %388 = vadd.xlane.f32.xlu2 %v387_v45  ;;  %1306 = vpow2.f32 %v338_v18  ;;  %v405_v48 = vmul.f32 %v1303_v19, %v1564_v42  ;;  %v1305_v29 = vpop.eup %1304 }
 0x29e   :  { %1223 = vmatmul.msk.bf16.gmra.mxu3 %vm285_vm1, %v400_v15  ;;  %1308 = vpow2.f32 %v362_v23  ;;  %v406_v33 = vmul.f32 %v1305_v29, %v1564_v42 }
 0x29f   :  { %1310 = vpow2.f32 %v364_v25 }
 0x2a0   :  { %1312 = vpow2.f32 %v360_v26 }
 0x2a3   :  { %v1307_v31 = vpop.eup %1306 }
 0x2a4   :  { %v1662_v32 = vpop.eup %1308  ;;  %v401_v35 = vpack.c.bf16 %v1299_v5, %v1307_v31  ;;  %v384_v53 = vsel %vm285_vm1, %v1307_v31, 0.0 }
 0x2a5   :  { %v408_v37 = vmul.f32 %v1662_v32, %v1564_v42  ;;  %v1669_v38 = vpop.eup %1310 }
 0x2a6   :  { %436 = vrot.lane.b32.xlu1 %v405_v48, %s1395_s19  ;;  %v1313_v39 = vpop.eup %1312  ;;  %v409_v41 = vmul.f32 %v1669_v38, %v1564_v42 }
 0x2a7   :  { %v407_v43 = vmul.f32 %v1313_v39, %v1564_v42 }
 0x2ae   :  { %438 = vrot.lane.b32.xlu1 %v406_v33, %s1395_s19  ;;  %1224 = vmatmul.msk.bf16.gmra.mxu3 %vm285_vm1, %v401_v35 }
 0x2b1   :  { %442 = vrot.lane.b32.xlu0 %v408_v37, %s1395_s19 }
 0x2b5   :  { %444 = vrot.lane.b32.xlu2 %v409_v41, %s1395_s19 }
 0x2b6   :  { %440 = vrot.lane.b32.xlu1 %v407_v43, %s1395_s19 }
 0x2bd   :  { %v368_v49 = vpop.xlane.xlu2 %367 }
 0x2be   :  { %v390_v51 = vadd.f32 %v1629_v6, %v368_v49  ;;  %v431_v54 = vpop.permute.xlu0 %430 }
 0x2c0   :  { %1314 = vrcp.f32 %v390_v51 }
 0x2c5   :  { %v371_v50 = vpop.xlane.xlu1 %370  ;;  %v433_v56 = vpop.permute.xlu2 %432 }
 0x2c6   :  { %v391_v42 = vadd.f32 %v1644_v34, %v371_v50  ;;  %v1315_v59 = vpop.eup %1314 }
 0x2c8   :  { %1316 = vrcp.f32 %v391_v42 }
 0x2cd   :  { %v374_v6 = vpop.xlane.xlu1 %373 }
 0x2ce   :  { %v1317_v61 = vpop.eup %1316  ;;  %v392_v0 = vadd.f32 %v1637_v30, %v374_v6  ;;  %v435_v40 = vpop.permute.xlu0 %434 }
 0x2d0   :  { %1318 = vrcp.f32 %v392_v0 }
 0x2d6   :  { %v1319_v4 = vpop.eup %1318 }
 0x2de   :  { %v475_v52 = vpop.f32.mrf.mxu2 }
 0x2df   :  { %v476_v55 = vadd.f32 %v475_v52, %v431_v54 }
 0x2e0   :  { %385 = vadd.xlane.f32.xlu1 %v384_v53 }
 0x2e1   :  { %v503_v36 = vmul.f32 %v1315_v59, %v476_v55 }
 0x2e6   :  { %v477_v57 = vpop.f32.mrf.mxu2 }
 0x2e7   :  { %v478_v60 = vadd.f32 %v477_v57, %v433_v56 }
 0x2e9   :  { %v504_v62 = vmul.f32 %v1317_v61, %v478_v60 }
 0x2eb   :  { %v511_v63 = vpack.c.bf16 %v504_v62, %v503_v36 }
 0x2ed   :  { %1233 = vmatmul.msk.bf16.vlgmr.msra.gmra.mxu1 %vm104_vm0, %v511_v63 }
 0x300   :  { %v377_v34 = vpop.xlane.xlu1 %376 }
 0x301   :  { %v393_v58 = vadd.f32 %v1303_v19, %v377_v34 }
 0x303   :  { %1320 = vrcp.f32 %v393_v58 }
 0x308   :  { %v380_v14 = vpop.xlane.xlu2 %379 }
 0x309   :  { %v1321_v7 = vpop.eup %1320  ;;  %v394_v16 = vadd.f32 %v1305_v29, %v380_v14 }
 0x30b   :  { %1322 = vrcp.f32 %v394_v16 }
 0x310   :  { %v383_v45 = vpop.xlane.xlu0 %382  ;;  %v389_v29 = vpop.xlane.xlu2 %388 }
 0x311   :  { %v480_v1 = vpop.f32.mrf.mxu3  ;;  %v395_v30 = vadd.f32 %v1313_v39, %v383_v45  ;;  %v1323_v24 = vpop.eup %1322  ;;  %v397_v37 = vadd.f32 %v1669_v38, %v389_v29  ;;  %v1275_v38 = vld [vmem:[%s2020_s5] ss:$0 sm:$0xff] }
 0x312   :  { %v481_v2 = vadd.f32 %v480_v1, %v435_v40 }
 0x313   :  { %1324 = vrcp.f32 %v395_v30 }
 0x314   :  { %v505_v12 = vmul.f32 %v1319_v4, %v481_v2  ;;  %1326 = vrcp.f32 %v397_v37 }
 0x318   :  { %v437_v47 = vpop.permute.xlu1 %436  ;;  %v445_v44 = vpop.permute.xlu2 %444 }
 0x319   :  { %v482_v3 = vpop.f32.mrf.mxu3  ;;  %v1325_v25 = vpop.eup %1324 }
 0x31a   :  { %v483_v5 = vadd.f32 %v482_v3, %v437_v47  ;;  %v1327_v50 = vpop.eup %1326 }
 0x31c   :  { %v506_v13 = vmul.f32 %v1321_v7, %v483_v5  ;;  %v1396_v7 = vmov 32.0  }
 0x31e   :  { %v512_v15 = vpack.c.bf16 %v506_v13, %v505_v12 }
 0x320   :  { %v439_v17 = vpop.permute.xlu1 %438  ;;  %1234 = vmatmul.msk.bf16.gmra.mxu1 %vm104_vm0, %v512_v15 }
 0x321   :  { %v485_v18 = vpop.f32.mrf.mxu3 }
 0x322   :  { %v486_v19 = vadd.f32 %v485_v18, %v439_v17 }
 0x323   :  { %v443_v49 = vpop.permute.xlu0 %442 }
 0x324   :  { %v507_v26 = vmul.f32 %v1323_v24, %v486_v19 }
 0x328   :  { %v441_v22 = vpop.permute.xlu1 %440 }
 0x329   :  { %v487_v23 = vpop.f32.mrf.mxu3 }
 0x32a   :  { %v488_v48 = vadd.f32 %v487_v23, %v441_v22 }
 0x32c   :  { %v508_v31 = vmul.f32 %v1325_v25, %v488_v48 }
 0x32e   :  { %v513_v33 = vpack.c.bf16 %v508_v31, %v507_v26 }
 0x330   :  { %1235 = vmatmul.msk.bf16.gmra.mxu1 %vm104_vm0, %v513_v33 }
 0x331   :  { %v490_v35 = vpop.f32.mrf.mxu3 }
 0x332   :  { %v491_v51 = vadd.f32 %v490_v35, %v443_v49 }
 0x339   :  { %v492_v43 = vpop.f32.mrf.mxu3 }
 0x33a   :  { %v493_v46 = vadd.f32 %v492_v43, %v445_v44 }
 0x33c   :  { %v510_v52 = vmul.f32 %v1327_v50, %v493_v46 }
 0x353   :  { %v386_v41 = vpop.xlane.xlu1 %385 }
 0x354   :  { %v396_v39 = vadd.f32 %v1662_v32, %v386_v41 }
 0x356   :  { %1328 = vrcp.f32 %v396_v39 }
 0x357   :  { %1330 = vrcp.f32 %v1396_v7 }
 0x35c   :  { %v1329_v42 = vpop.eup %1328 }
 0x35d   :  { %v509_v53 = vmul.f32 %v1329_v42, %v491_v51 }
 0x35f   :  { %v514_v54 = vpack.c.bf16 %v510_v52, %v509_v53 }
 0x361   :  { %1236 = vmatmul.msk.bf16.gmra.mxu1 %vm104_vm0, %v514_v54 }
 0x36a   :  { %v556_v55 = vpop.f32.mrf.mxu1 }
 0x36b   :  { %v557_v32 = vadd.f32 %v1275_v38, %v556_v55 }
 0x36d   :  { %v576_v56 = vadd.f32 %v557_v32, %v1508_v8 }
 0x36f   :  { %v584_v57 = vsel %vm104_vm0, %v576_v56, 0.0 }
 0x370   :  { %585 = vadd.xlane.f32.xlu0 %v584_v57 }
 0x372   :  { %v558_v59 = vpop.f32.mrf.mxu1 }
 0x373   :  { %v559_v60 = vadd.f32 %v1275_v38, %v558_v59 }
 0x375   :  { %v577_v61 = vadd.f32 %v559_v60, %v1510_v9  ;;  %v1260_v60 = vld [vmem:[%s2023_s8 + $0x8] sm:$0xff] }
 0x376   :  { %833 = vmatpush.bf16.msrb.mxu0 %v1260_v60 }
 0x377   :  { %v587_v36 = vsel %vm104_vm0, %v577_v61, 0.0 }
 0x378   :  { %588 = vadd.xlane.f32.xlu2 %v587_v36 }
 0x39d   :  { %v561_v62 = vpop.f32.mrf.mxu1 }
 0x39e   :  { %v562_v63 = vadd.f32 %v1275_v38, %v561_v62 }
 0x3a0   :  { %v578_v6 = vadd.f32 %v562_v63, %v1531_v20  ;;  %v1259_v63 = vld [vmem:[%s2023_s8] sm:$0xff] }
 0x3a1   :  { %834 = vmatpush.bf16.msrb.mxu0 %v1259_v63 }
 0x3a2   :  { %v590_v34 = vsel %vm104_vm0, %v578_v6, 0.0 }
 0x3a3   :  { %591 = vadd.xlane.f32.xlu1 %v590_v34 }
 0x3a5   :  { %v563_v0 = vpop.f32.mrf.mxu1 }
 0x3a6   :  { %v564_v58 = vadd.f32 %v1275_v38, %v563_v0 }
 0x3a8   :  { %v579_v8 = vadd.f32 %v564_v58, %v1533_v21  ;;  %v1331_v21 = vpop.eup %1330 }
 0x3a9   :  { %v609_v12 = vmul.f32 32.0, %v1331_v21  ;;  %vm613_vm2 = vweird.f32 %v1331_v21 }
 0x3aa   :  { %v593_v1 = vsel %vm104_vm0, %v579_v8, 0.0 }
 0x3ab   :  { %594 = vadd.xlane.f32.xlu1 %v593_v1  ;;  %v610_v13 = vsub.f32 1.0, %v609_v12 }
 0x3ad   :  { %v566_v40 = vpop.f32.mrf.mxu1  ;;  %v611_v14 = vmul.f32 %v1331_v21, %v610_v13 }
 0x3ae   :  { %v567_v2 = vadd.f32 %v1275_v38, %v566_v40 }
 0x3af   :  { %v612_v45 = vadd.f32 %v1331_v21, %v611_v14 }
 0x3b0   :  { %v580_v9 = vadd.f32 %v567_v2, %v1545_v27 }
 0x3b1   :  { %v1708_v27 = vsel %vm613_vm2, %v1331_v21, %v612_v45 }
 0x3b2   :  { %v596_v47 = vsel %vm104_vm0, %v580_v9, 0.0 }
 0x3b3   :  { %597 = vadd.xlane.f32.xlu1 %v596_v47 }
 0x3b5   :  { %v568_v3 = vpop.f32.mrf.mxu1 }
 0x3b6   :  { %v569_v4 = vadd.f32 %v1275_v38, %v568_v3 }
 0x3b8   :  { %v581_v20 = vadd.f32 %v569_v4, %v1547_v28 }
 0x3ba   :  { %v599_v5 = vsel %vm104_vm0, %v581_v20, 0.0 }
 0x3bb   :  { %600 = vadd.xlane.f32.xlu1 %v599_v5 }
 0x3de   :  { %v571_v15 = vpop.f32.mrf.mxu1 }
 0x3df   :  { %v572_v23 = vadd.f32 %v1275_v38, %v571_v15 }
 0x3e1   :  { %v582_v33 = vadd.f32 %v572_v23, %v1512_v10 }
 0x3e3   :  { %v586_v16 = vpop.xlane.xlu0 %585 }
 0x3e4   :  { %v615_v17 = vmul.f32 %v1708_v27, %v586_v16 }
 0x3e6   :  { %v1711_v30 = vsub.f32 %v576_v56, %v615_v17  ;;  %v573_v28 = vpop.f32.mrf.mxu1 }
 0x3e7   :  { %v574_v18 = vadd.f32 %v1275_v38, %v573_v28 }
 0x3e8   :  { %v631_v19 = vmul.f32 %v1711_v30, %v1711_v30 }
 0x3e9   :  { %v583_v22 = vadd.f32 %v574_v18, %v1514_v11  ;;  %v602_v11 = vsel %vm104_vm0, %v582_v33, 0.0 }
 0x3ea   :  { %v639_v24 = vsel %vm104_vm0, %v631_v19, 0.0 }
 0x3eb   :  { %v589_v48 = vpop.xlane.xlu2 %588  ;;  %640 = vadd.xlane.f32.xlu0 %v639_v24  ;;  %v605_v25 = vsel %vm104_vm0, %v583_v22, 0.0 }
 0x3ec   :  { %v616_v26 = vmul.f32 %v1708_v27, %v589_v48  ;;  %606 = vadd.xlane.f32.xlu2 %v605_v25 }
 0x3ee   :  { %v1719_v31 = vsub.f32 %v577_v61, %v616_v26  ;;  %v1781_v26 = vld [vmem:[%s2022_s7] ss:$0 sm:$0xff] }
 0x3f0   :  { %v632_v35 = vmul.f32 %v1719_v31, %v1719_v31 }
 0x3f2   :  { %v642_v29 = vsel %vm104_vm0, %v632_v35, 0.0 }
 0x3f3   :  { %643 = vadd.xlane.f32.xlu1 %v642_v29  ;;  %603 = vadd.xlane.f32.xlu0 %v602_v11 }
 0x416   :  { %v592_v37 = vpop.xlane.xlu1 %591 }
 0x417   :  { %v617_v41 = vmul.f32 %v1708_v27, %v592_v37 }
 0x419   :  { %v1727_v39 = vsub.f32 %v578_v6, %v617_v41 }
 0x41b   :  { %v633_v43 = vmul.f32 %v1727_v39, %v1727_v39 }
 0x41d   :  { %v645_v44 = vsel %vm104_vm0, %v633_v43, 0.0 }
 0x41e   :  { %v595_v10 = vpop.xlane.xlu1 %594  ;;  %646 = vadd.xlane.f32.xlu1 %v645_v44 }
 0x41f   :  { %v618_v46 = vmul.f32 %v1708_v27, %v595_v10 }
 0x421   :  { %v1733_v49 = vsub.f32 %v579_v8, %v618_v46 }
 0x423   :  { %v634_v50 = vmul.f32 %v1733_v49, %v1733_v49 }
 0x425   :  { %v648_v51 = vsel %vm104_vm0, %v634_v50, 0.0 }
 0x426   :  { %v598_v42 = vpop.xlane.xlu1 %597  ;;  %649 = vadd.xlane.f32.xlu0 %v648_v51 }
 0x427   :  { %v619_v52 = vmul.f32 %v1708_v27, %v598_v42 }
 0x429   :  { %v1739_v53 = vsub.f32 %v580_v9, %v619_v52 }
 0x42b   :  { %v635_v54 = vmul.f32 %v1739_v53, %v1739_v53 }
 0x42d   :  { %v651_v38 = vsel %vm104_vm0, %v635_v54, 0.0 }
 0x42e   :  { %v601_v55 = vpop.xlane.xlu1 %600  ;;  %652 = vadd.xlane.f32.xlu2 %v651_v38 }
 0x42f   :  { %v620_v32 = vmul.f32 %v1708_v27, %v601_v55 }
 0x431   :  { %v1745_v56 = vsub.f32 %v581_v20, %v620_v32 }
 0x433   :  { %v636_v57 = vmul.f32 %v1745_v56, %v1745_v56 }
 0x435   :  { %v654_v59 = vsel %vm104_vm0, %v636_v57, 0.0 }
 0x436   :  { %655 = vadd.xlane.f32.xlu1 %v654_v59 }
 0x45e   :  { %v641_v61 = vpop.xlane.xlu0 %640 }
 0x45f   :  { %v663_v36 = vmul.f32 %v641_v61, %v1708_v27  ;;  %v607_v62 = vpop.xlane.xlu2 %606 }
 0x460   :  { %v622_v6 = vmul.f32 %v1708_v27, %v607_v62 }
 0x461   :  { %v671_v34 = vadd.f32 1e-05, %v663_v36 }
 0x462   :  { %v1758_v0 = vsub.f32 %v583_v22, %v622_v6  ;;  %v1774_v22 = vld [vmem:[%s2021_s6] ss:$0 sm:$0xff] }
 0x463   :  { %1332 = vrsqrt.f32 %v671_v34  ;;  %vm685_vm4 = vweird.f32 %v671_v34 }
 0x464   :  { %v638_v58 = vmul.f32 %v1758_v0, %v1758_v0 }
 0x466   :  { %v644_v8 = vpop.xlane.xlu1 %643  ;;  %v604_v1 = vpop.xlane.xlu0 %603  ;;  %v660_v40 = vsel %vm104_vm0, %v638_v58, 0.0 }
 0x467   :  { %v664_v2 = vmul.f32 %v644_v8, %v1708_v27  ;;  %v621_v9 = vmul.f32 %v1708_v27, %v604_v1  ;;  %661 = vadd.xlane.f32.xlu2 %v660_v40 }
 0x469   :  { %v1333_v47 = vpop.eup %1332  ;;  %v672_v3 = vadd.f32 1e-05, %v664_v2  ;;  %v1765_v4 = vsub.f32 %v582_v33, %v621_v9 }
 0x46a   :  { %v680_v20 = vmul.f32 %v1333_v47, %v671_v34  ;;  %vm686_vm3 = vweird.f32 %v1333_v47 }
 0x46b   :  { %1334 = vrsqrt.f32 %v672_v3  ;;  %v637_v5 = vmul.f32 %v1765_v4, %v1765_v4  ;;  %vm687_vm5 = vmor %vm685_vm4, %vm686_vm3  ;;  %vm695_vm7 = vweird.f32 %v672_v3 }
 0x46c   :  { %v681_v7 = vmul.f32 %v1333_v47, %v680_v20 }
 0x46d   :  { %v657_v21 = vsel %vm104_vm0, %v637_v5, 0.0 }
 0x46e   :  { %v682_v12 = vmul.f32 0.5, %v681_v7  ;;  %658 = vadd.xlane.f32.xlu0 %v657_v21 }
 0x470   :  { %v683_v13 = vsub.f32 1.5, %v682_v12 }
 0x471   :  { %v1335_v14 = vpop.eup %1334 }
 0x472   :  { %v684_v45 = vmul.f32 %v1333_v47, %v683_v13  ;;  %v690_v15 = vmul.f32 %v1335_v14, %v672_v3  ;;  %vm696_vm6 = vweird.f32 %v1335_v14 }
 0x473   :  { %vm697_vm8 = vmor %vm695_vm7, %vm696_vm6  ;;  %vm886_vm7 = vcmask 1043456  }
 0x474   :  { %v691_v16 = vmul.f32 %v1335_v14, %v690_v15  ;;  %v688_v17 = vsel %vm687_vm5, %v1333_v47, %v684_v45 }
 0x475   :  { %v759_v19 = vmul.f32 %v688_v17, %v1711_v30 }
 0x476   :  { %v692_v28 = vmul.f32 0.5, %v691_v16 }
 0x477   :  { %v771_v25 = vmul.f32 %v1774_v22, %v759_v19 }
 0x478   :  { %v693_v18 = vsub.f32 1.5, %v692_v28 }
 0x479   :  { %v1785_v33 = vadd.f32 %v1781_v26, %v771_v25 }
 0x47a   :  { %v694_v23 = vmul.f32 %v1335_v14, %v693_v18 }
 0x47c   :  { %v698_v24 = vsel %vm697_vm8, %v1335_v14, %v694_v23 }
 0x47d   :  { %v760_v48 = vmul.f32 %v698_v24, %v1719_v31 }
 0x47f   :  { %v772_v30 = vmul.f32 %v1774_v22, %v760_v48 }
 0x481   :  { %v1788_v35 = vadd.f32 %v1781_v26, %v772_v30 }
 0x483   :  { %v791_v29 = vpack.c.bf16 %v1788_v35, %v1785_v33 }
 0x485   :  { %1245 = vmatmul.msk.bf16.vlgmr.msrb.gmra.mxu0 %vm104_vm0, %v791_v29 }
 0x491   :  { %v647_v31 = vpop.xlane.xlu1 %646 }
 0x492   :  { %v665_v11 = vmul.f32 %v647_v31, %v1708_v27 }
 0x494   :  { %v673_v37 = vadd.f32 1e-05, %v665_v11 }
 0x496   :  { %1336 = vrsqrt.f32 %v673_v37  ;;  %vm705_vm10 = vweird.f32 %v673_v37 }
 0x499   :  { %v650_v41 = vpop.xlane.xlu0 %649 }
 0x49a   :  { %v666_v43 = vmul.f32 %v650_v41, %v1708_v27 }
 0x49c   :  { %v1337_v44 = vpop.eup %1336  ;;  %v674_v10 = vadd.f32 1e-05, %v666_v43 }
 0x49d   :  { %v700_v46 = vmul.f32 %v1337_v44, %v673_v37  ;;  %vm706_vm9 = vweird.f32 %v1337_v44 }
 0x49e   :  { %1338 = vrsqrt.f32 %v674_v10  ;;  %vm707_vm11 = vmor %vm705_vm10, %vm706_vm9  ;;  %vm715_vm13 = vweird.f32 %v674_v10 }
 0x49f   :  { %v701_v50 = vmul.f32 %v1337_v44, %v700_v46 }
 0x4a1   :  { %v702_v51 = vmul.f32 0.5, %v701_v50  ;;  %v653_v42 = vpop.xlane.xlu2 %652 }
 0x4a2   :  { %v667_v52 = vmul.f32 %v653_v42, %v1708_v27  ;;  %v868_v42 = vld [vmem:[%s2025_s10] sm:$0xf] }
 0x4a3   :  { %v703_v54 = vsub.f32 1.5, %v702_v51 }
 0x4a4   :  { %v1339_v38 = vpop.eup %1338  ;;  %v675_v55 = vadd.f32 1e-05, %v667_v52 }
 0x4a5   :  { %v704_v32 = vmul.f32 %v1337_v44, %v703_v54  ;;  %v710_v57 = vmul.f32 %v1339_v38, %v674_v10  ;;  %vm716_vm12 = vweird.f32 %v1339_v38  ;;  %v888_v54 = vsel %vm886_vm7, %v868_v42, 0 }
 0x4a6   :  { %1340 = vrsqrt.f32 %v675_v55  ;;  %vm717_vm14 = vmor %vm715_vm13, %vm716_vm12  ;;  %vm725_vm1 = vweird.f32 %v675_v55  ;;  %897 = vmatpush.bf16.msrb.mxu3 %v888_v54  ;;  %vm873_vm13 = vcmask 64512  }
 0x4a7   :  { %v711_v59 = vmul.f32 %v1339_v38, %v710_v57  ;;  %v708_v60 = vsel %vm707_vm11, %v1337_v44, %v704_v32 }
 0x4a8   :  { %v761_v34 = vmul.f32 %v708_v60, %v1727_v39 }
 0x4a9   :  { %v712_v61 = vmul.f32 0.5, %v711_v59  ;;  %v656_v36 = vpop.xlane.xlu1 %655 }
 0x4aa   :  { %v668_v62 = vmul.f32 %v656_v36, %v1708_v27  ;;  %v773_v47 = vmul.f32 %v1774_v22, %v761_v34 }
 0x4ab   :  { %v713_v63 = vsub.f32 1.5, %v712_v61 }
 0x4ac   :  { %v1341_v6 = vpop.eup %1340  ;;  %v676_v58 = vadd.f32 1e-05, %v668_v62  ;;  %v1802_v21 = vadd.f32 %v1781_v26, %v773_v47 }
 0x4ad   :  { %v714_v8 = vmul.f32 %v1339_v38, %v713_v63  ;;  %v720_v1 = vmul.f32 %v1341_v6, %v675_v55  ;;  %vm726_vm15 = vweird.f32 %v1341_v6 }
 0x4ae   :  { %1342 = vrsqrt.f32 %v676_v58  ;;  %vm727_vm2 = vmor %vm725_vm1, %vm726_vm15  ;;  %vm735_vm4 = vweird.f32 %v676_v58 }
 0x4af   :  { %v718_v40 = vsel %vm717_vm14, %v1339_v38, %v714_v8  ;;  %v721_v2 = vmul.f32 %v1341_v6, %v720_v1 }
 0x4b0   :  { %v762_v9 = vmul.f32 %v718_v40, %v1733_v49 }
 0x4b1   :  { %v722_v3 = vmul.f32 0.5, %v721_v2 }
 0x4b2   :  { %v774_v20 = vmul.f32 %v1774_v22, %v762_v9 }
 0x4b3   :  { %v723_v5 = vsub.f32 1.5, %v722_v3 }
 0x4b4   :  { %v1343_v7 = vpop.eup %1342  ;;  %v1805_v39 = vadd.f32 %v1781_v26, %v774_v20 }
 0x4b5   :  { %v724_v12 = vmul.f32 %v1341_v6, %v723_v5  ;;  %v730_v13 = vmul.f32 %v1343_v7, %v676_v58  ;;  %vm736_vm3 = vweird.f32 %v1343_v7 }
 0x4b6   :  { %v792_v14 = vpack.c.bf16 %v1805_v39, %v1802_v21  ;;  %vm737_vm5 = vmor %vm735_vm4, %vm736_vm3 }
 0x4b7   :  { %v731_v49 = vmul.f32 %v1343_v7, %v730_v13  ;;  %v728_v45 = vsel %vm727_vm2, %v1341_v6, %v724_v12 }
 0x4b8   :  { %1246 = vmatmul.msk.bf16.gmra.mxu0 %vm104_vm0, %v792_v14  ;;  %v763_v17 = vmul.f32 %v728_v45, %v1739_v53 }
 0x4b9   :  { %v732_v15 = vmul.f32 0.5, %v731_v49 }
 0x4ba   :  { %v775_v23 = vmul.f32 %v1774_v22, %v763_v17 }
 0x4bb   :  { %v733_v16 = vsub.f32 1.5, %v732_v15 }
 0x4bc   :  { %v1815_v48 = vadd.f32 %v1781_v26, %v775_v23 }
 0x4bd   :  { %v734_v28 = vmul.f32 %v1343_v7, %v733_v16 }
 0x4bf   :  { %v738_v18 = vsel %vm737_vm5, %v1343_v7, %v734_v28 }
 0x4c0   :  { %v764_v19 = vmul.f32 %v738_v18, %v1745_v56 }
 0x4c2   :  { %v776_v24 = vmul.f32 %v1774_v22, %v764_v19 }
 0x4c4   :  { %v1818_v25 = vadd.f32 %v1781_v26, %v776_v24 }
 0x4c6   :  { %v793_v30 = vpack.c.bf16 %v1818_v25, %v1815_v48 }
 0x4c8   :  { %1247 = vmatmul.msk.bf16.gmra.mxu0 %vm104_vm0, %v793_v30 }
 0x4da   :  { %v662_v53 = vpop.xlane.xlu2 %661 }
 0x4db   :  { %v670_v29 = vmul.f32 %v662_v53, %v1708_v27 }
 0x4dd   :  { %v678_v31 = vadd.f32 1e-05, %v670_v29 }
 0x4df   :  { %1344 = vrsqrt.f32 %v678_v31  ;;  %vm755_vm8 = vweird.f32 %v678_v31 }
 0x4e1   :  { %v659_v56 = vpop.xlane.xlu0 %658 }
 0x4e2   :  { %v669_v11 = vmul.f32 %v659_v56, %v1708_v27 }
 0x4e4   :  { %v677_v37 = vadd.f32 1e-05, %v669_v11 }
 0x4e5   :  { %v1345_v41 = vpop.eup %1344 }
 0x4e6   :  { %v750_v43 = vmul.f32 %v1345_v41, %v678_v31  ;;  %1346 = vrsqrt.f32 %v677_v37  ;;  %vm756_vm6 = vweird.f32 %v1345_v41  ;;  %vm745_vm11 = vweird.f32 %v677_v37 }
 0x4e7   :  { %vm757_vm9 = vmor %vm755_vm8, %vm756_vm6 }
 0x4e8   :  { %v751_v44 = vmul.f32 %v1345_v41, %v750_v43 }
 0x4ea   :  { %v752_v10 = vmul.f32 0.5, %v751_v44 }
 0x4ec   :  { %v1347_v46 = vpop.eup %1346  ;;  %v753_v50 = vsub.f32 1.5, %v752_v10 }
 0x4ed   :  { %v740_v51 = vmul.f32 %v1347_v46, %v677_v37  ;;  %vm746_vm10 = vweird.f32 %v1347_v46  ;;  %v1279_v37 = vld [vmem:[%s2026_s11] ss:$0 sm:$0xff] }
 0x4ee   :  { %v754_v52 = vmul.f32 %v1345_v41, %v753_v50  ;;  %vm747_vm12 = vmor %vm745_vm11, %vm746_vm10 }
 0x4ef   :  { %v741_v38 = vmul.f32 %v1347_v46, %v740_v51 }
 0x4f0   :  { %v758_v55 = vsel %vm757_vm9, %v1345_v41, %v754_v52 }
 0x4f1   :  { %v742_v32 = vmul.f32 0.5, %v741_v38  ;;  %v766_v59 = vmul.f32 %v758_v55, %v1758_v0  ;;  %v1278_v0 = vld [vmem:[%s2024_s9] ss:$0 sm:$0xff] }
 0x4f3   :  { %v743_v57 = vsub.f32 1.5, %v742_v32  ;;  %v778_v62 = vmul.f32 %v1774_v22, %v766_v59 }
 0x4f5   :  { %v744_v60 = vmul.f32 %v1347_v46, %v743_v57  ;;  %v790_v34 = vadd.f32 %v1781_v26, %v778_v62 }
 0x4f7   :  { %v748_v61 = vsel %vm747_vm12, %v1347_v46, %v744_v60 }
 0x4f8   :  { %v765_v36 = vmul.f32 %v748_v61, %v1765_v4 }
 0x4fa   :  { %v777_v63 = vmul.f32 %v1774_v22, %v765_v36 }
 0x4fc   :  { %v789_v6 = vadd.f32 %v1781_v26, %v777_v63 }
 0x4fe   :  { %v794_v58 = vpack.c.bf16 %v790_v34, %v789_v6 }
 0x500   :  { %1248 = vmatmul.msk.bf16.gmra.mxu0 %vm104_vm0, %v794_v58 }
 0x502   :  { %v836_v8 = vpop.f32.mrf.mxu0 }
 0x503   :  { %v837_v1 = vadd.f32 %v1278_v0, %v836_v8 }
 0x505   :  { %v856_v4 = vmax.f32 %v837_v1, 0.0 }
 0x50a   :  { %v838_v40 = vpop.f32.mrf.mxu0 }
 0x50b   :  { %v839_v2 = vadd.f32 %v1278_v0, %v838_v40 }
 0x50d   :  { %v857_v9 = vmax.f32 %v839_v2, 0.0 }
 0x50f   :  { %v864_v47 = vpack.c.bf16 %v857_v9, %v856_v4 }
 0x511   :  { %1249 = vmatmul.msk.bf16.vlgmr.msrb.gmra.mxu3 %vm873_vm13, %v864_v47 }
 0x535   :  { %v841_v22 = vpop.f32.mrf.mxu0 }
 0x536   :  { %v842_v3 = vadd.f32 %v1278_v0, %v841_v22 }
 0x538   :  { %v858_v5 = vmax.f32 %v842_v3, 0.0 }
 0x53d   :  { %v843_v26 = vpop.f32.mrf.mxu0 }
 0x53e   :  { %v844_v20 = vadd.f32 %v1278_v0, %v843_v26 }
 0x540   :  { %v859_v7 = vmax.f32 %v844_v20, 0.0 }
 0x542   :  { %v865_v12 = vpack.c.bf16 %v859_v7, %v858_v5 }
 0x544   :  { %1250 = vmatmul.msk.bf16.gmra.mxu3 %vm873_vm13, %v865_v12 }
 0x545   :  { %v846_v13 = vpop.f32.mrf.mxu0 }
 0x546   :  { %v847_v14 = vadd.f32 %v1278_v0, %v846_v13 }
 0x548   :  { %v860_v15 = vmax.f32 %v847_v14, 0.0 }
 0x54d   :  { %v848_v49 = vpop.f32.mrf.mxu0 }
 0x54e   :  { %v849_v45 = vadd.f32 %v1278_v0, %v848_v49 }
 0x550   :  { %v861_v16 = vmax.f32 %v849_v45, 0.0 }
 0x552   :  { %v866_v17 = vpack.c.bf16 %v861_v16, %v860_v15 }
 0x554   :  { %1251 = vmatmul.msk.bf16.gmra.mxu3 %vm873_vm13, %v866_v17 }
 0x57d   :  { %v851_v28 = vpop.f32.mrf.mxu0 }
 0x57e   :  { %v852_v18 = vadd.f32 %v1278_v0, %v851_v28 }
 0x580   :  { %v862_v24 = vmax.f32 %v852_v18, 0.0 }
 0x585   :  { %v853_v19 = vpop.f32.mrf.mxu0 }
 0x586   :  { %v854_v23 = vadd.f32 %v1278_v0, %v853_v19 }
 0x588   :  { %v863_v30 = vmax.f32 %v854_v23, 0.0 }
 0x58a   :  { %v867_v53 = vpack.c.bf16 %v863_v30, %v862_v24 }
 0x58c   :  { %1252 = vmatmul.msk.bf16.gmra.mxu3 %vm873_vm13, %v867_v53 }
 0x594   :  { %v899_v29 = vpop.f32.mrf.mxu3 }
 0x595   :  { %v900_v61 = vadd.f32 %v1279_v37, %v899_v29 }
 0x59c   :  { %v901_v31 = vpop.f32.mrf.mxu3 }
 0x59d   :  { %v902_v58 = vadd.f32 %v1279_v37, %v901_v31 }
 0x5c7   :  { %v904_v56 = vpop.f32.mrf.mxu3 }
 0x5c8   :  { %v905_v36 = vadd.f32 %v1279_v37, %v904_v56 }
 0x5ca   :  { %v921_v63 = vadd.f32 %v905_v36, %v1802_v21 }
 0x5cc   :  { %v933_v8 = vsel %vm104_vm0, %v921_v63, 0.0 }
 0x5cf   :  { %v906_v11 = vpop.f32.mrf.mxu3 }
 0x5d0   :  { %v907_v10 = vadd.f32 %v1279_v37, %v906_v11 }
 0x5d2   :  { %v922_v50 = vadd.f32 %v907_v10, %v1805_v39 }
 0x5d4   :  { %v936_v51 = vsel %vm104_vm0, %v922_v50, 0.0 }
 0x5d7   :  { %v909_v41 = vpop.f32.mrf.mxu3 }
 0x5d8   :  { %v910_v43 = vadd.f32 %v1279_v37, %v909_v41 }
 0x5da   :  { %v923_v44 = vadd.f32 %v910_v43, %v1815_v48 }
 0x5dc   :  { %v939_v46 = vsel %vm104_vm0, %v923_v44, 0.0 }
 0x5dd   :  { %940 = vadd.xlane.f32.xlu2 %v939_v46 }
 0x5df   :  { %v911_v42 = vpop.f32.mrf.mxu3 }
 0x5e0   :  { %v912_v55 = vadd.f32 %v1279_v37, %v911_v42 }
 0x5e2   :  { %v924_v48 = vadd.f32 %v912_v55, %v1818_v25  ;;  %v920_v25 = vadd.f32 %v902_v58, %v1788_v35 }
 0x5e4   :  { %v942_v62 = vsel %vm104_vm0, %v924_v48, 0.0 }
 0x5e5   :  { %937 = vadd.xlane.f32.xlu2 %v936_v51 }
 0x60f   :  { %v914_v52 = vpop.f32.mrf.mxu3 }
 0x610   :  { %v915_v54 = vadd.f32 %v1279_v37, %v914_v52 }
 0x612   :  { %v925_v38 = vadd.f32 %v915_v54, %v789_v6  ;;  %v919_v6 = vadd.f32 %v900_v61, %v1785_v33 }
 0x614   :  { %v945_v32 = vsel %vm104_vm0, %v925_v38, 0.0  ;;  %v927_v0 = vsel %vm104_vm0, %v919_v6, 0.0 }
 0x615   :  { %946 = vadd.xlane.f32.xlu1 %v945_v32 }
 0x617   :  { %v916_v57 = vpop.f32.mrf.mxu3 }
 0x618   :  { %v917_v59 = vadd.f32 %v1279_v37, %v916_v57 }
 0x61a   :  { %v926_v60 = vadd.f32 %v917_v59, %v790_v34  ;;  %v930_v34 = vsel %vm104_vm0, %v920_v25, 0.0 }
 0x61c   :  { %v948_v39 = vsel %vm104_vm0, %v926_v60, 0.0 }
 0x61d   :  { %949 = vadd.xlane.f32.xlu0 %v948_v39  ;;  %943 = vadd.xlane.f32.xlu1 %v942_v62 }
 0x625   :  { %934 = vadd.xlane.f32.xlu0 %v933_v8  ;;  %928 = vadd.xlane.f32.xlu1 %v927_v0 }
 0x62d   :  { %931 = vadd.xlane.f32.xlu0 %v930_v34 }
 0x650   :  { %v941_v1 = vpop.xlane.xlu2 %940 }
 0x651   :  { %v955_v40 = vmul.f32 %v941_v1, %v1708_v27 }
 0x653   :  { %v1860_v2 = vsub.f32 %v923_v44, %v955_v40 }
 0x655   :  { %v971_v33 = vmul.f32 %v1860_v2, %v1860_v2 }
 0x657   :  { %v987_v21 = vsel %vm104_vm0, %v971_v33, 0.0 }
 0x658   :  { %v938_v4 = vpop.xlane.xlu2 %937  ;;  %988 = vadd.xlane.f32.xlu0 %v987_v21 }
 0x659   :  { %v954_v9 = vmul.f32 %v938_v4, %v1708_v27 }
 0x65b   :  { %v1866_v47 = vsub.f32 %v922_v50, %v954_v9 }
 0x65d   :  { %v970_v35 = vmul.f32 %v1866_v47, %v1866_v47 }
 0x65f   :  { %v984_v22 = vsel %vm104_vm0, %v970_v35, 0.0 }
 0x660   :  { %985 = vadd.xlane.f32.xlu0 %v984_v22 }
 0x688   :  { %v947_v3 = vpop.xlane.xlu1 %946 }
 0x689   :  { %v957_v26 = vmul.f32 %v947_v3, %v1708_v27 }
 0x68b   :  { %v1872_v20 = vsub.f32 %v925_v38, %v957_v26 }
 0x68d   :  { %v973_v5 = vmul.f32 %v1872_v20, %v1872_v20 }
 0x68f   :  { %v993_v7 = vsel %vm104_vm0, %v973_v5, 0.0 }
 0x690   :  { %v950_v12 = vpop.xlane.xlu0 %949  ;;  %994 = vadd.xlane.f32.xlu2 %v993_v7  ;;  %v944_v13 = vpop.xlane.xlu1 %943 }
 0x691   :  { %v958_v14 = vmul.f32 %v950_v12, %v1708_v27  ;;  %v956_v49 = vmul.f32 %v944_v13, %v1708_v27 }
 0x693   :  { %v1879_v45 = vsub.f32 %v926_v60, %v958_v14  ;;  %v1881_v15 = vsub.f32 %v924_v48, %v956_v49 }
 0x695   :  { %v974_v16 = vmul.f32 %v1879_v45, %v1879_v45  ;;  %v972_v17 = vmul.f32 %v1881_v15, %v1881_v15 }
 0x697   :  { %v996_v28 = vsel %vm104_vm0, %v974_v16, 0.0  ;;  %v990_v18 = vsel %vm104_vm0, %v972_v17, 0.0 }
 0x698   :  { %v935_v19 = vpop.xlane.xlu0 %934  ;;  %997 = vadd.xlane.f32.xlu1 %v996_v28  ;;  %991 = vadd.xlane.f32.xlu2 %v990_v18  ;;  %v929_v23 = vpop.xlane.xlu1 %928 }
 0x699   :  { %v953_v24 = vmul.f32 %v935_v19, %v1708_v27  ;;  %v951_v30 = vmul.f32 %v929_v23, %v1708_v27 }
 0x69b   :  { %v1891_v53 = vsub.f32 %v921_v63, %v953_v24  ;;  %v1893_v29 = vsub.f32 %v919_v6, %v951_v30 }
 0x69d   :  { %v969_v31 = vmul.f32 %v1891_v53, %v1891_v53  ;;  %v967_v56 = vmul.f32 %v1893_v29, %v1893_v29 }
 0x69f   :  { %v981_v11 = vsel %vm104_vm0, %v969_v31, 0.0  ;;  %v975_v37 = vsel %vm104_vm0, %v967_v56, 0.0 }
 0x6a0   :  { %v932_v41 = vpop.xlane.xlu0 %931  ;;  %982 = vadd.xlane.f32.xlu1 %v981_v11  ;;  %976 = vadd.xlane.f32.xlu2 %v975_v37 }
 0x6a1   :  { %v952_v43 = vmul.f32 %v932_v41, %v1708_v27 }
 0x6a3   :  { %v1902_v44 = vsub.f32 %v920_v25, %v952_v43 }
 0x6a5   :  { %v968_v10 = vmul.f32 %v1902_v44, %v1902_v44 }
 0x6a7   :  { %v978_v46 = vsel %vm104_vm0, %v968_v10, 0.0 }
 0x6a8   :  { %979 = vadd.xlane.f32.xlu1 %v978_v46 }
 0x6cb   :  { %v989_v50 = vpop.xlane.xlu0 %988 }
 0x6cc   :  { %v1003_v51 = vmul.f32 %v989_v50, %v1708_v27 }
 0x6ce   :  { %v1908_v42 = vadd.f32 1e-05, %v1003_v51 }
 0x6d0   :  { %1348 = vrsqrt.f32 %v1908_v42  ;;  %vm1061_vm4 = vweird.f32 %v1908_v42 }
 0x6d3   :  { %v986_v52 = vpop.xlane.xlu0 %985 }
 0x6d4   :  { %v1002_v38 = vmul.f32 %v986_v52, %v1708_v27 }
 0x6d6   :  { %v1913_v57 = vadd.f32 1e-05, %v1002_v38  ;;  %v1915_v59 = vpop.eup %1348 }
 0x6d7   :  { %v1056_v39 = vmul.f32 %v1915_v59, %v1908_v42  ;;  %vm1062_vm2 = vweird.f32 %v1915_v59 }
 0x6d8   :  { %vm1950_vm6 = vmor %vm1061_vm4, %vm1062_vm2  ;;  %vm1051_vm13 = vweird.f32 %v1913_v57 }
 0x6d9   :  { %v1057_v8 = vmul.f32 %v1915_v59, %v1056_v39 }
 0x6db   :  { %v1058_v4 = vmul.f32 0.5, %v1057_v8 }
 0x6dd   :  { %v1059_v14 = vsub.f32 1.5, %v1058_v4 }
 0x6df   :  { %v1060_v31 = vmul.f32 %v1915_v59, %v1059_v14  ;;  %v1132_v14 = vld [vmem:[#allocation2] sm:$0x1] }
 0x703   :  { %v995_v54 = vpop.xlane.xlu2 %994 }
 0x704   :  { %v1005_v55 = vmul.f32 %v995_v54, %v1708_v27  ;;  %v1064_v54 = vsel %vm1950_vm6, %v1915_v59, %v1060_v31 }
 0x706   :  { %v1013_v32 = vadd.f32 1e-05, %v1005_v55 }
 0x708   :  { %1350 = vrsqrt.f32 %v1013_v32  ;;  %vm1081_vm15 = vweird.f32 %v1013_v32 }
 0x709   :  { %1352 = vrsqrt.f32 %v1913_v57 }
 0x70b   :  { %v992_v48 = vpop.xlane.xlu2 %991  ;;  %v998_v60 = vpop.xlane.xlu1 %997 }
 0x70c   :  { %v1004_v61 = vmul.f32 %v992_v48, %v1708_v27  ;;  %v1006_v36 = vmul.f32 %v998_v60, %v1708_v27 }
 0x70e   :  { %v1351_v62 = vpop.eup %1350  ;;  %v1012_v63 = vadd.f32 1e-05, %v1004_v61  ;;  %v1014_v6 = vadd.f32 1e-05, %v1006_v36 }
 0x70f   :  { %v1076_v58 = vmul.f32 %v1351_v62, %v1013_v32  ;;  %v1923_v25 = vpop.eup %1352  ;;  %vm1082_vm14 = vweird.f32 %v1351_v62 }
 0x710   :  { %1354 = vrsqrt.f32 %v1012_v63  ;;  %v1046_v9 = vmul.f32 %v1923_v25, %v1913_v57  ;;  %vm1936_vm1 = vmor %vm1081_vm15, %vm1082_vm14  ;;  %vm1071_vm7 = vweird.f32 %v1012_v63  ;;  %vm1091_vm9 = vweird.f32 %v1014_v6 }
 0x711   :  { %v1077_v0 = vmul.f32 %v1351_v62, %v1076_v58  ;;  %1356 = vrsqrt.f32 %v1014_v6  ;;  %vm1052_vm11 = vweird.f32 %v1923_v25  ;;  %v1099_v58 = vmul.f32 %v1064_v54, %v1860_v2 }
 0x712   :  { %v1047_v49 = vmul.f32 %v1923_v25, %v1046_v9  ;;  %vm1982_vm14 = vmor %vm1051_vm13, %vm1052_vm11 }
 0x713   :  { %v1078_v34 = vmul.f32 0.5, %v1077_v0  ;;  %v977_v1 = vpop.xlane.xlu2 %976  ;;  %v983_v40 = vpop.xlane.xlu1 %982 }
 0x714   :  { %v999_v33 = vmul.f32 %v977_v1, %v1708_v27  ;;  %v1001_v21 = vmul.f32 %v983_v40, %v1708_v27  ;;  %v1048_v56 = vmul.f32 0.5, %v1047_v49 }
 0x715   :  { %v1079_v35 = vsub.f32 1.5, %v1078_v34 }
 0x716   :  { %v1355_v22 = vpop.eup %1354  ;;  %v1929_v3 = vadd.f32 1e-05, %v999_v33  ;;  %v1931_v26 = vadd.f32 1e-05, %v1001_v21  ;;  %v1049_v38 = vsub.f32 1.5, %v1048_v56 }
 0x717   :  { %v1357_v5 = vpop.eup %1356  ;;  %v1066_v7 = vmul.f32 %v1355_v22, %v1012_v63  ;;  %v1080_v12 = vmul.f32 %v1351_v62, %v1079_v35  ;;  %vm1072_vm3 = vweird.f32 %v1355_v22 }
 0x718   :  { %v1086_v13 = vmul.f32 %v1357_v5, %v1014_v6  ;;  %1358 = vrsqrt.f32 %v1929_v3  ;;  %vm1092_vm5 = vweird.f32 %v1357_v5  ;;  %vm1073_vm8 = vmor %vm1071_vm7, %vm1072_vm3  ;;  %v1281_v6 = vld [vmem:[%s2028_s13] ss:$0 sm:$0xff]  ;;  %vm1041_vm15 = vweird.f32 %v1931_v26 }
 0x719   :  { %v1067_v16 = vmul.f32 %v1355_v22, %v1066_v7  ;;  %1360 = vrsqrt.f32 %v1931_v26  ;;  %v1084_v23 = vsel %vm1936_vm1, %v1351_v62, %v1080_v12  ;;  %vm1093_vm10 = vmor %vm1091_vm9, %vm1092_vm5  ;;  %v1050_v62 = vmul.f32 %v1923_v25, %v1049_v38 }
 0x71a   :  { %v1087_v17 = vmul.f32 %v1357_v5, %v1086_v13  ;;  %vm1021_vm5 = vweird.f32 %v1929_v3 }
 0x71b   :  { %v1068_v18 = vmul.f32 0.5, %v1067_v16  ;;  %v980_v19 = vpop.xlane.xlu1 %979  ;;  %v1054_v57 = vsel %vm1982_vm14, %v1923_v25, %v1050_v62 }
 0x71c   :  { %v1088_v24 = vmul.f32 0.5, %v1087_v17  ;;  %v1000_v30 = vmul.f32 %v980_v19, %v1708_v27  ;;  %v1101_v27 = vmul.f32 %v1084_v23, %v1872_v20  ;;  %v1966_v20 = vld [vmem:[%s2027_s12] ss:$0 sm:$0xff]  ;;  %v1098_v17 = vmul.f32 %v1054_v57, %v1866_v47 }
 0x71d   :  { %v1069_v11 = vsub.f32 1.5, %v1068_v18  ;;  %v1111_v9 = vmul.f32 %v1966_v20, %v1099_v58 }
 0x71e   :  { %v1945_v37 = vpop.eup %1358  ;;  %v1089_v41 = vsub.f32 1.5, %v1088_v24  ;;  %v1948_v43 = vadd.f32 1e-05, %v1000_v30  ;;  %v1113_v39 = vmul.f32 %v1966_v20, %v1101_v27  ;;  %v1110_v23 = vmul.f32 %v1966_v20, %v1098_v17 }
 0x71f   :  { %v1361_v10 = vpop.eup %1360  ;;  %v1070_v50 = vmul.f32 %v1355_v22, %v1069_v11  ;;  %v1016_v51 = vmul.f32 %v1945_v37, %v1929_v3  ;;  %v1123_v16 = vadd.f32 %v1281_v6, %v1111_v9  ;;  %vm1022_vm3 = vweird.f32 %v1945_v37 }
 0x720   :  { %v1090_v52 = vmul.f32 %v1357_v5, %v1089_v41  ;;  %v1036_v42 = vmul.f32 %v1361_v10, %v1931_v26  ;;  %1362 = vrsqrt.f32 %v1948_v43  ;;  %vm1042_vm12 = vweird.f32 %v1361_v10  ;;  %vm1023_vm7 = vmor %vm1021_vm5, %vm1022_vm3 }
 0x721   :  { %v1074_v55 = vsel %vm1073_vm8, %v1355_v22, %v1070_v50  ;;  %v1017_v48 = vmul.f32 %v1945_v37, %v1016_v51  ;;  %v1125_v1 = vadd.f32 %v1281_v6, %v1113_v39  ;;  %vm1043_vm1 = vmor %vm1041_vm15, %vm1042_vm12  ;;  %v1397_v26 = vmov 0  }
 0x722   :  { %v1094_v32 = vsel %vm1093_vm10, %v1357_v5, %v1090_v52  ;;  %v1037_v60 = vmul.f32 %v1361_v10, %v1036_v42  ;;  %v1100_v61 = vmul.f32 %v1074_v55, %v1881_v15  ;;  %1272 = vset.pattern.permute.xlu0 %v1397_v26  ;;  %vm1031_vm4 = vweird.f32 %v1948_v43 }
 0x723   :  { %v1102_v36 = vmul.f32 %v1094_v32, %v1879_v45  ;;  %v1018_v0 = vmul.f32 0.5, %v1017_v48  ;;  %1135 = vperm.xlu0 %1272, %v1132_v14   ;;  %v1122_v56 = vadd.f32 %v1281_v6, %v1110_v23  ;;  %vm1186_vm10 = vcmask 516096  }
 0x724   :  { %v1038_v59 = vmul.f32 0.5, %v1037_v60  ;;  %v1112_v45 = vmul.f32 %v1966_v20, %v1100_v61 }
 0x725   :  { %v1114_v63 = vmul.f32 %v1966_v20, %v1102_v36  ;;  %v1019_v35 = vsub.f32 1.5, %v1018_v0 }
 0x726   :  { %v1363_v8 = vpop.eup %1362  ;;  %v1039_v15 = vsub.f32 1.5, %v1038_v59  ;;  %v1124_v5 = vadd.f32 %v1281_v6, %v1112_v45 }
 0x727   :  { %v1026_v34 = vmul.f32 %v1363_v8, %v1948_v43  ;;  %v1126_v40 = vadd.f32 %v1281_v6, %v1114_v63  ;;  %vm1032_vm2 = vweird.f32 %v1363_v8  ;;  %v1020_v25 = vmul.f32 %v1945_v37, %v1019_v35 }
 0x728   :  { %v1040_v21 = vmul.f32 %v1361_v10, %v1039_v15  ;;  %v1130_v18 = vpack.c.bf16 %v1124_v5, %v1123_v16  ;;  %vm1033_vm6 = vmor %vm1031_vm4, %vm1032_vm2 }
 0x729   :  { %v1027_v2 = vmul.f32 %v1363_v8, %v1026_v34  ;;  %v1131_v4 = vpack.c.bf16 %v1126_v40, %v1125_v1  ;;  %v1024_v47 = vsel %vm1023_vm7, %v1945_v37, %v1020_v25 }
 0x72a   :  { %v1044_v22 = vsel %vm1043_vm1, %v1361_v10, %v1040_v21  ;;  %v1149_v24 = vsel %vm104_vm0, %v1130_v18, 0  ;;  %v1095_v11 = vmul.f32 %v1024_v47, %v1893_v29 }
 0x72b   :  { %v1028_v7 = vmul.f32 0.5, %v1027_v2  ;;  %v1152_v12 = vsel %vm104_vm0, %v1131_v4, 0  ;;  %v1097_v13 = vmul.f32 %v1044_v22, %v1891_v53 }
 0x72c   :  { %1158 = vmatpush.bf16.xpose.msrb.mxu1 %v1152_v12  ;;  %v1107_v3 = vmul.f32 %v1966_v20, %v1095_v11 }
 0x72d   :  { %v1029_v49 = vsub.f32 1.5, %v1028_v7  ;;  %v1109_v53 = vmul.f32 %v1966_v20, %v1097_v13 }
 0x72e   :  { %v1119_v27 = vadd.f32 %v1281_v6, %v1107_v3 }
 0x72f   :  { %v1030_v28 = vmul.f32 %v1363_v8, %v1029_v49  ;;  %v1121_v30 = vadd.f32 %v1281_v6, %v1109_v53 }
 0x731   :  { %v1034_v19 = vsel %vm1033_vm6, %v1363_v8, %v1030_v28  ;;  %v1129_v41 = vpack.c.bf16 %v1122_v56, %v1121_v30 }
 0x732   :  { %v1096_v31 = vmul.f32 %v1034_v19, %v1902_v44  ;;  %v1127_v44 = vld [vmem:[%s2029_s14] sm:$0x1]  ;;  %s1398_s14 = smov [#allocation3]  }
 0x733   :  { %v1146_v10 = vsel %vm104_vm0, %v1129_v41, 0  ;;  %s1193_s17 = sshll.u32 %s1398_s14, 4  ;;  %s1194_s17 = int_to_ptr.vmem [resolvable:$true] %s1193_s17 }
 0x734   :  { %1159 = vmatpush.bf16.xpose.msrb.mxu1 %v1149_v24  ;;  %v1108_v43 = vmul.f32 %v1966_v20, %v1096_v31 }
 0x736   :  { %v1120_v46 = vadd.f32 %v1281_v6, %v1108_v43 }
 0x738   :  { %v1128_v37 = vpack.c.bf16 %v1120_v46, %v1119_v27 }
 0x73a   :  { %v1143_v50 = vsel %vm104_vm0, %v1128_v37, 0 }
 0x73c   :  { %1160 = vmatpush.bf16.xpose.msrb.mxu1 %v1146_v10 }
 0x744   :  { %1161 = vmatpush.bf16.xpose.msrb.mxu1 %v1143_v50 }
 0x74b   :  { %1253 = vmatmul.msk.bf16.vlgmr.msrb.gmra.mxu1 %vm104_vm0, %v1127_v44 }
 0x795   :  { %v1136_v29 = vpop.permute.xlu0 %1135 }
 0x796   :  { %v1138_v51 = vperm.slane %v1136_v29, 0 }
 0x7c8   :  { %v1163_v52 = vpop.f32.mrf.mxu1 }
 0x7c9   :  { %v1164_v42 = vadd.f32 %v1163_v52, %v1138_v51 }
 0x7cb   :  { %v1254_v54 = vmul.f32 -1.442695, %v1164_v42 }
 0x7cd   :  { %1364 = vpow2.f32 %v1254_v54 }
 0x7d0   :  { %v1165_v38 = vpop.f32.mrf.mxu1 }
 0x7d3   :  { %v1365_v55 = vpop.eup %1364 }
 0x7d4   :  { %v1170_v20 = vadd.f32 1.0, %v1365_v55 }
 0x7d6   :  { %1366 = vrcp.f32 %v1170_v20  ;;  %v1182_v61 = vand.u32 2147483648, %v1170_v20  ;;  %v1180_v39 = vand.u32 2147483647, %v1170_v20  ;;  %vm1176_vm0 = vweird.f32 %v1170_v20 }
 0x7d8   :  { %v1183_v62 = vor.u32 1.1754944e-38, %v1182_v61  ;;  %vm1181_vm11 = vcmp.eq.f32.partialorder %v1180_v39, 8.507059e+37 }
 0x7dc   :  { %v1367_v32 = vpop.eup %1366 }
 0x7dd   :  { %v1172_v48 = vmul.f32 %v1367_v32, %v1170_v20  ;;  %vm1177_vm8 = vweird.f32 %v1367_v32 }
 0x7de   :  { %vm1178_vm9 = vmor %vm1176_vm0, %vm1177_vm8 }
 0x7df   :  { %v1173_v60 = vsub.f32 1.0, %v1172_v48 }
 0x7e1   :  { %v1174_v36 = vmul.f32 %v1367_v32, %v1173_v60 }
 0x7e3   :  { %v1175_v59 = vadd.f32 %v1367_v32, %v1174_v36 }
 0x7e5   :  { %v1179_v63 = vsel %vm1178_vm9, %v1367_v32, %v1175_v59 }
 0x7e6   :  { %v1184_v6 = vsel %vm1181_vm11, %v1183_v62, %v1179_v63 }
 0x7e7   :  { %1187 = vst.msk [vmem:[#allocation3] sm:$0x1] %vm1186_vm10, %v1184_v6 }
 0x7e8   :  { %1198 = dma.vmem_to_hbm [thread:$0]  %s1194_s17, 16, %s1196_s3, [#allocation4]  }
 0x7e9   :  { %1392 = dma.done.wait [#allocation4], 16  }
 0x7ea   :  { %1393 = vsyncadd [#allocation4], 4294967280 }
 0x7eb   :  { %1203 = vsyncpa [#allocation4], 1 }

</bundles_post_ra>
